<compile_context>
chip_gen: v6e
topology: v6e:2x2x1
jax: 0.10.0
libtpu: 0.0.40
codegen_flags: <defaults>
</compile_context>

<pallas_src>
import math

import jax
import jax.numpy as jnp
from jax import lax
from jax.experimental import pallas as pl
from jax.experimental.pallas import tpu as pltpu


def _patch_expand_fused_kernel(x_ref, w_ref, g_ref, b_ref, o_ref):
    # x_ref: (tm*W, dim)       -- tm*W pixels of the (B*H*W, dim) view of x
    # w_ref: (dim, 2*dim)      -- expansion weight (transposed: y = x @ w)
    # g_ref, b_ref: (1, C)     -- LayerNorm affine params, C = dim // 2
    # o_ref: (tm, 2, W, 2*C)   -- contiguous view of the rearranged output
    tm, _, W, two_c = o_ref.shape
    C = two_c // 2
    eps = 1e-5                            # PyTorch LayerNorm default

    x = x_ref[...]                        # (TM, dim), TM = tm*W
    g = g_ref[...].astype(jnp.float32)    # hoisted out of the p1/p2 loops
    b = b_ref[...].astype(jnp.float32)

    # channel layout of an expansion-output row: [p1, p2, c], chunk k = 2*p1+p2.
    # N-split matmul: compute + normalize + store one p1 half-plane at a time,
    # so only a (TM, 2C) f32 intermediate is ever live.
    for p1 in range(2):
        w_half = w_ref[:, p1 * two_c:(p1 + 1) * two_c]        # static slice (view)
        y = jnp.dot(x, w_half, preferred_element_type=jnp.float32)   # (TM, 2C) f32
        halves = []
        for p2 in range(2):
            yk = y[:, p2 * C:(p2 + 1) * C]                    # (TM, C)
            mk = jnp.mean(yk, axis=-1, keepdims=True)
            ck = yk - mk
            vk = jnp.mean(ck * ck, axis=-1, keepdims=True)
            halves.append(ck * lax.rsqrt(vk + eps) * g + b)
        yp = jnp.concatenate(halves, axis=-1)                 # (TM, 2C)
        o_ref[:, pl.ds(p1, 1), :, :] = (
            yp.reshape(tm, 1, W, two_c).astype(o_ref.dtype)
        )


def _choose_tm(BH, W, bytes_per_row, fixed_bytes, budget):
    """Rows (of W pixels) per grid step.

    Constraints (in priority order):
      1. tm*W sublane-aligned (multiple of 8) or tm == BH  -> legal layout
      2. >= 2 grid steps when BH >= 2                      -> v7x megacore
      3. as large as the VMEM budget allows                -> HBM roofline
    """
    q = 8 // math.gcd(W, 8)               # smallest tm with (tm*W) % 8 == 0
    tm = max(1, int((budget - fixed_bytes) // max(1, bytes_per_row)))
    if BH > 1:
        tm = min(tm, -(-BH // 2))         # keep at least 2 grid steps
    tm = min(tm, BH)
    if q < BH:
        tm = max(q, (tm // q) * q)        # align; stays < BH so grid >= 2
    else:
        tm = BH                           # single full block keeps layout legal
    return max(1, min(tm, BH))


def patch_expanding(x, w_expand, gamma, beta, *, vmem_budget_bytes=24 * 1024 * 1024):
    """Fused PatchExpanding forward.

    x:        (B, H, W, dim) channels-last token map
    w_expand: (dim, 2*dim)   == nn.Linear(dim, 2*dim, bias=False).weight.T
    gamma, beta: (dim // 2,) LayerNorm affine params
    returns:  (B, 2H, 2W, dim // 2)
    """
    B, H, W, dim = x.shape
    assert dim % 2 == 0
    assert w_expand.shape == (dim, 2 * dim)
    C = dim // 2
    BH = B * H

    x2 = x.reshape(BH * W, dim)           # metadata-only reshape (no repack)
    g2 = gamma.reshape(1, C)
    b2 = beta.reshape(1, C)

    # --- VMEM accounting (per row of W pixels) ---
    isz = jnp.dtype(x.dtype).itemsize
    wsz = jnp.dtype(w_expand.dtype).itemsize
    bytes_per_row = (
        2 * W * dim * isz                 # x block, double-buffered
        + 4 * W * dim * isz               # output block (2x elements), double-buffered
        + 3 * W * dim * 4                 # f32 half-matmul result + LN temporaries
    )
    weight_bytes = dim * 2 * dim * wsz    # single-buffered (pl.Buffered(1))
    fixed_bytes = weight_bytes + (1 << 20)

    tm = _choose_tm(BH, W, bytes_per_row, fixed_bytes, vmem_budget_bytes)
    grid = (pl.cdiv(BH, tm),)

    # Tell the compiler about the budget; cap at 48 MiB so it is safe on v7x
    # (64 MiB physical per TC) while still raising the default v5e 16 MiB limit.
    vmem_limit_bytes = int(
        min(48 << 20, max(16 << 20, weight_bytes + tm * bytes_per_row + (4 << 20)))
    )

    def _run(single_buffer_consts):
        const_kwargs = (
            dict(pipeline_mode=pl.Buffered(1)) if single_buffer_consts else {}
        )
        in_specs = [
            pl.BlockSpec((tm * W, dim), lambda i: (i, 0)),
            # Grid-constant operands: never re-DMA'd; single-buffer them to
            # return the second buffer's VMEM to the row tile.
            pl.BlockSpec((dim, 2 * dim), lambda i: (0, 0), **const_kwargs),
            pl.BlockSpec((1, C), lambda i: (0, 0), **const_kwargs),
            pl.BlockSpec((1, C), lambda i: (0, 0), **const_kwargs),
        ]
        return pl.pallas_call(
            _patch_expand_fused_kernel,
            out_shape=jax.ShapeDtypeStruct((BH, 2, W, 2 * C), x.dtype),
            grid_spec=pltpu.PrefetchScalarGridSpec(
                num_scalar_prefetch=0,
                grid=grid,
                in_specs=in_specs,
                out_specs=pl.BlockSpec((tm, 2, W, 2 * C), lambda i: (i, 0, 0, 0)),
            ),
            compiler_params=pltpu.CompilerParams(
                dimension_semantics=("parallel",),
                vmem_limit_bytes=vmem_limit_bytes,
            ),
        )(x2, w_expand, g2, b2)

    try:
        out = _run(True)
    except Exception:
        # Fallback for jax versions without pl.Buffered(1) support on constants.
        out = _run(False)

    # (BH, 2, W, 2C) -> (B, 2H, 2W, C) is a contiguous (metadata-only) reshape.
    return out.reshape(B, 2 * H, 2 * W, C)


def _reference(x, w_expand, gamma, beta):
    B, H, W, dim = x.shape
    C = dim // 2
    y = x @ w_expand
    y = y.reshape(B, H, W, 2, 2, C).transpose(0, 1, 3, 2, 4, 5).reshape(
        B, 2 * H, 2 * W, C
    )
    mean = y.mean(-1, keepdims=True)
    var = ((y - mean) ** 2).mean(-1, keepdims=True)
    return (y - mean) / jnp.sqrt(var + 1e-5) * gamma + beta


if __name__ == "__main__":
    key = jax.random.PRNGKey(0)

    # --- main test: B=2, H=W=8, dim=32 (grid of 2 steps, aligned tiles) ---
    B, H, W, dim = 2, 8, 8, 32
    kx, kw, kg, kb = jax.random.split(key, 4)
    x = jax.random.normal(kx, (B, H, W, dim), dtype=jnp.float32)
    # nn.Linear(dim, 2*dim, bias=False).weight has shape (2*dim, dim);
    # forward computes x @ weight.T, so the kernel consumes the transpose.
    w = jax.random.normal(kw, (2 * dim, dim), dtype=jnp.float32) * 0.05
    w_t = w.T  # (dim, 2*dim)
    gamma = jax.random.normal(kg, (dim // 2,), dtype=jnp.float32)
    beta = jax.random.normal(kb, (dim // 2,), dtype=jnp.float32)

    out = patch_expanding(x, w_t, gamma, beta)
    out = jax.block_until_ready(out)
    ref = _reference(x, w_t, gamma, beta)
    assert out.shape == (B, 2 * H, 2 * W, dim // 2), out.shape
    assert jnp.allclose(out, ref, atol=1e-4, rtol=1e-4), float(
        jnp.max(jnp.abs(out - ref))
    )

    # --- robustness test: W=7 (Swin-style), non-divisible BH -> cdiv grid ---
    B2, H2, W2, dim2 = 1, 9, 7, 32
    kx2, kw2, kg2, kb2 = jax.random.split(jax.random.PRNGKey(1), 4)
    x2 = jax.random.normal(kx2, (B2, H2, W2, dim2), dtype=jnp.float32)
    w2 = jax.random.normal(kw2, (2 * dim2, dim2), dtype=jnp.float32) * 0.05
    g2 = jax.random.normal(kg2, (dim2 // 2,), dtype=jnp.float32)
    b2 = jax.random.normal(kb2, (dim2 // 2,), dtype=jnp.float32)

    out2 = jax.block_until_ready(patch_expanding(x2, w2.T, g2, b2))
    ref2 = _reference(x2, w2.T, g2, b2)
    assert out2.shape == (B2, 2 * H2, 2 * W2, dim2 // 2), out2.shape
    assert jnp.allclose(out2, ref2, atol=1e-4, rtol=1e-4), float(
        jnp.max(jnp.abs(out2 - ref2))
    )

    print("KERNEL_OK")
</pallas_src>

<mosaic_0001>
module attributes {stable_mosaic.version = 11 : i64} {
  func.func @_patch_expand_fused_kernel(%arg0: i32, %arg1: memref<64x32xf32, #tpu.memory_space<vmem>>, %arg2: memref<32x64xf32, #tpu.memory_space<vmem>>, %arg3: memref<1x16xf32, #tpu.memory_space<vmem>>, %arg4: memref<1x16xf32, #tpu.memory_space<vmem>>, %arg5: memref<8x2x8x32xf32, #tpu.memory_space<vmem>>) attributes {dimension_semantics = [#tpu.dimension_semantics<parallel>], iteration_bounds = array<i64: 2>, scalar_prefetch = 0 : i64, scratch_operands = 0 : i64, tpu.core_type = #tpu.core_type<tc>, window_params = [{transform_indices = @transform_0, window_bounds = array<i64: 64, 32>}, {pipeline_mode = #tpu.pipeline_mode<synchronous>, transform_indices = @transform_1, window_bounds = array<i64: 32, 64>}, {pipeline_mode = #tpu.pipeline_mode<synchronous>, transform_indices = @transform_2, window_bounds = array<i64: 1, 16>}, {pipeline_mode = #tpu.pipeline_mode<synchronous>, transform_indices = @transform_3, window_bounds = array<i64: 1, 16>}, {transform_indices = @transform_4, window_bounds = array<i64: 8, 2, 8, 32>}]} {
    %c0 = arith.constant 0 : index
    %c0_0 = arith.constant 0 : index
    %0 = vector.load %arg1[%c0, %c0_0] : memref<64x32xf32, #tpu.memory_space<vmem>>, vector<64x32xf32>
    %c0_1 = arith.constant 0 : index
    %c0_2 = arith.constant 0 : index
    %1 = vector.load %arg3[%c0_1, %c0_2] : memref<1x16xf32, #tpu.memory_space<vmem>>, vector<1x16xf32>
    %c0_3 = arith.constant 0 : index
    %c0_4 = arith.constant 0 : index
    %2 = vector.load %arg4[%c0_3, %c0_4] : memref<1x16xf32, #tpu.memory_space<vmem>>, vector<1x16xf32>
    %c0_5 = arith.constant 0 : index
    %c0_6 = arith.constant 0 : index
    %3 = vector.load %arg2[%c0_5, %c0_6] : memref<32x64xf32, #tpu.memory_space<vmem>>, vector<32x32xf32>
    %cst = arith.constant dense<0.000000e+00> : vector<64x32xf32>
    %4 = tpu.matmul %0, %3, %cst {dimension_numbers = #tpu.dot_dimension_numbers<[1], [0], [0], [1], [0, 0, 1, 1], [], []>} : vector<64x32xf32>, vector<32x32xf32>, vector<64x32xf32> -> vector<64x32xf32>
    %5 = vector.extract_strided_slice %4 {offsets = [0, 0], sizes = [64, 16], strides = [1, 1]} : vector<64x32xf32> to vector<64x16xf32>
    %cst_7 = arith.constant dense<0.000000e+00> : vector<64xf32>
    %6 = vector.multi_reduction <add>, %5, %cst_7 [1] : vector<64x16xf32> to vector<64xf32>
    %7 = vector.shape_cast %6 : vector<64xf32> to vector<64x1xf32>
    %cst_8 = arith.constant 1.600000e+01 : f32
    %8 = vector.broadcast %cst_8 : f32 to vector<64x1xf32>
    %9 = arith.divf %7, %8 : vector<64x1xf32>
    %10 = vector.broadcast %9 : vector<64x1xf32> to vector<64x16xf32>
    %11 = arith.subf %5, %10 : vector<64x16xf32>
    %12 = arith.mulf %11, %11 : vector<64x16xf32>
    %cst_9 = arith.constant dense<0.000000e+00> : vector<64xf32>
    %13 = vector.multi_reduction <add>, %12, %cst_9 [1] : vector<64x16xf32> to vector<64xf32>
    %14 = vector.shape_cast %13 : vector<64xf32> to vector<64x1xf32>
    %cst_10 = arith.constant 1.600000e+01 : f32
    %15 = vector.broadcast %cst_10 : f32 to vector<64x1xf32>
    %16 = arith.divf %14, %15 : vector<64x1xf32>
    %cst_11 = arith.constant 9.99999974E-6 : f32
    %17 = vector.broadcast %cst_11 : f32 to vector<64x1xf32>
    %18 = arith.addf %16, %17 : vector<64x1xf32>
    %19 = math.rsqrt %18 : vector<64x1xf32>
    %20 = vector.broadcast %19 : vector<64x1xf32> to vector<64x16xf32>
    %21 = arith.mulf %11, %20 : vector<64x16xf32>
    %22 = vector.broadcast %1 : vector<1x16xf32> to vector<64x16xf32>
    %23 = arith.mulf %21, %22 : vector<64x16xf32>
    %24 = vector.broadcast %2 : vector<1x16xf32> to vector<64x16xf32>
    %25 = arith.addf %23, %24 : vector<64x16xf32>
    %26 = vector.extract_strided_slice %4 {offsets = [0, 16], sizes = [64, 16], strides = [1, 1]} : vector<64x32xf32> to vector<64x16xf32>
    %cst_12 = arith.constant dense<0.000000e+00> : vector<64xf32>
    %27 = vector.multi_reduction <add>, %26, %cst_12 [1] : vector<64x16xf32> to vector<64xf32>
    %28 = vector.shape_cast %27 : vector<64xf32> to vector<64x1xf32>
    %cst_13 = arith.constant 1.600000e+01 : f32
    %29 = vector.broadcast %cst_13 : f32 to vector<64x1xf32>
    %30 = arith.divf %28, %29 : vector<64x1xf32>
    %31 = vector.broadcast %30 : vector<64x1xf32> to vector<64x16xf32>
    %32 = arith.subf %26, %31 : vector<64x16xf32>
    %33 = arith.mulf %32, %32 : vector<64x16xf32>
    %cst_14 = arith.constant dense<0.000000e+00> : vector<64xf32>
    %34 = vector.multi_reduction <add>, %33, %cst_14 [1] : vector<64x16xf32> to vector<64xf32>
    %35 = vector.shape_cast %34 : vector<64xf32> to vector<64x1xf32>
    %cst_15 = arith.constant 1.600000e+01 : f32
    %36 = vector.broadcast %cst_15 : f32 to vector<64x1xf32>
    %37 = arith.divf %35, %36 : vector<64x1xf32>
    %cst_16 = arith.constant 9.99999974E-6 : f32
    %38 = vector.broadcast %cst_16 : f32 to vector<64x1xf32>
    %39 = arith.addf %37, %38 : vector<64x1xf32>
    %40 = math.rsqrt %39 : vector<64x1xf32>
    %41 = vector.broadcast %40 : vector<64x1xf32> to vector<64x16xf32>
    %42 = arith.mulf %32, %41 : vector<64x16xf32>
    %43 = vector.broadcast %1 : vector<1x16xf32> to vector<64x16xf32>
    %44 = arith.mulf %42, %43 : vector<64x16xf32>
    %45 = vector.broadcast %2 : vector<1x16xf32> to vector<64x16xf32>
    %46 = arith.addf %44, %45 : vector<64x16xf32>
    %47 = tpu.concatenate %25, %46 in 1 : vector<64x16xf32>, vector<64x16xf32> -> vector<64x32xf32>
    %48 = vector.shape_cast %47 : vector<64x32xf32> to vector<8x1x8x32xf32>
    %c0_17 = arith.constant 0 : index
    %c0_18 = arith.constant 0 : index
    %c0_19 = arith.constant 0 : index
    %c0_20 = arith.constant 0 : index
    %49 = vector.load %arg5[%c0_17, %c0_18, %c0_19, %c0_20] : memref<8x2x8x32xf32, #tpu.memory_space<vmem>>, vector<8x1x8x32xf32>
    tpu.vector_store %arg5[%c0_17, %c0_18, %c0_19, %c0_20], %48 {strides = array<i32>} : memref<8x2x8x32xf32, #tpu.memory_space<vmem>>, vector<8x1x8x32xf32>,
    %c0_21 = arith.constant 0 : index
    %c32 = arith.constant 32 : index
    %50 = vector.load %arg2[%c0_21, %c32] : memref<32x64xf32, #tpu.memory_space<vmem>>, vector<32x32xf32>
    %cst_22 = arith.constant dense<0.000000e+00> : vector<64x32xf32>
    %51 = tpu.matmul %0, %50, %cst_22 {dimension_numbers = #tpu.dot_dimension_numbers<[1], [0], [0], [1], [0, 0, 1, 1], [], []>} : vector<64x32xf32>, vector<32x32xf32>, vector<64x32xf32> -> vector<64x32xf32>
    %52 = vector.extract_strided_slice %51 {offsets = [0, 0], sizes = [64, 16], strides = [1, 1]} : vector<64x32xf32> to vector<64x16xf32>
    %cst_23 = arith.constant dense<0.000000e+00> : vector<64xf32>
    %53 = vector.multi_reduction <add>, %52, %cst_23 [1] : vector<64x16xf32> to vector<64xf32>
    %54 = vector.shape_cast %53 : vector<64xf32> to vector<64x1xf32>
    %cst_24 = arith.constant 1.600000e+01 : f32
    %55 = vector.broadcast %cst_24 : f32 to vector<64x1xf32>
    %56 = arith.divf %54, %55 : vector<64x1xf32>
    %57 = vector.broadcast %56 : vector<64x1xf32> to vector<64x16xf32>
    %58 = arith.subf %52, %57 : vector<64x16xf32>
    %59 = arith.mulf %58, %58 : vector<64x16xf32>
    %cst_25 = arith.constant dense<0.000000e+00> : vector<64xf32>
    %60 = vector.multi_reduction <add>, %59, %cst_25 [1] : vector<64x16xf32> to vector<64xf32>
    %61 = vector.shape_cast %60 : vector<64xf32> to vector<64x1xf32>
    %cst_26 = arith.constant 1.600000e+01 : f32
    %62 = vector.broadcast %cst_26 : f32 to vector<64x1xf32>
    %63 = arith.divf %61, %62 : vector<64x1xf32>
    %cst_27 = arith.constant 9.99999974E-6 : f32
    %64 = vector.broadcast %cst_27 : f32 to vector<64x1xf32>
    %65 = arith.addf %63, %64 : vector<64x1xf32>
    %66 = math.rsqrt %65 : vector<64x1xf32>
    %67 = vector.broadcast %66 : vector<64x1xf32> to vector<64x16xf32>
    %68 = arith.mulf %58, %67 : vector<64x16xf32>
    %69 = vector.broadcast %1 : vector<1x16xf32> to vector<64x16xf32>
    %70 = arith.mulf %68, %69 : vector<64x16xf32>
    %71 = vector.broadcast %2 : vector<1x16xf32> to vector<64x16xf32>
    %72 = arith.addf %70, %71 : vector<64x16xf32>
    %73 = vector.extract_strided_slice %51 {offsets = [0, 16], sizes = [64, 16], strides = [1, 1]} : vector<64x32xf32> to vector<64x16xf32>
    %cst_28 = arith.constant dense<0.000000e+00> : vector<64xf32>
    %74 = vector.multi_reduction <add>, %73, %cst_28 [1] : vector<64x16xf32> to vector<64xf32>
    %75 = vector.shape_cast %74 : vector<64xf32> to vector<64x1xf32>
    %cst_29 = arith.constant 1.600000e+01 : f32
    %76 = vector.broadcast %cst_29 : f32 to vector<64x1xf32>
    %77 = arith.divf %75, %76 : vector<64x1xf32>
    %78 = vector.broadcast %77 : vector<64x1xf32> to vector<64x16xf32>
    %79 = arith.subf %73, %78 : vector<64x16xf32>
    %80 = arith.mulf %79, %79 : vector<64x16xf32>
    %cst_30 = arith.constant dense<0.000000e+00> : vector<64xf32>
    %81 = vector.multi_reduction <add>, %80, %cst_30 [1] : vector<64x16xf32> to vector<64xf32>
    %82 = vector.shape_cast %81 : vector<64xf32> to vector<64x1xf32>
    %cst_31 = arith.constant 1.600000e+01 : f32
    %83 = vector.broadcast %cst_31 : f32 to vector<64x1xf32>
    %84 = arith.divf %82, %83 : vector<64x1xf32>
    %cst_32 = arith.constant 9.99999974E-6 : f32
    %85 = vector.broadcast %cst_32 : f32 to vector<64x1xf32>
    %86 = arith.addf %84, %85 : vector<64x1xf32>
    %87 = math.rsqrt %86 : vector<64x1xf32>
    %88 = vector.broadcast %87 : vector<64x1xf32> to vector<64x16xf32>
    %89 = arith.mulf %79, %88 : vector<64x16xf32>
    %90 = vector.broadcast %1 : vector<1x16xf32> to vector<64x16xf32>
    %91 = arith.mulf %89, %90 : vector<64x16xf32>
    %92 = vector.broadcast %2 : vector<1x16xf32> to vector<64x16xf32>
    %93 = arith.addf %91, %92 : vector<64x16xf32>
    %94 = tpu.concatenate %72, %93 in 1 : vector<64x16xf32>, vector<64x16xf32> -> vector<64x32xf32>
    %95 = vector.shape_cast %94 : vector<64x32xf32> to vector<8x1x8x32xf32>
    %c0_33 = arith.constant 0 : index
    %c1 = arith.constant 1 : index
    %c0_34 = arith.constant 0 : index
    %c0_35 = arith.constant 0 : index
    %96 = vector.load %arg5[%c0_33, %c1, %c0_34, %c0_35] : memref<8x2x8x32xf32, #tpu.memory_space<vmem>>, vector<8x1x8x32xf32>
    tpu.vector_store %arg5[%c0_33, %c1, %c0_34, %c0_35], %95 {strides = array<i32>} : memref<8x2x8x32xf32, #tpu.memory_space<vmem>>, vector<8x1x8x32xf32>,
    return
  }
  func.func @transform_0(%arg0: i32) -> (i32, i32) {
    %c0_i32 = arith.constant 0 : i32
    %c0_i32_0 = arith.constant 0 : i32
    return %arg0, %c0_i32 : i32, i32
  }
  func.func @transform_1(%arg0: i32) -> (i32, i32) {
    %c0_i32 = arith.constant 0 : i32
    %c0_i32_0 = arith.constant 0 : i32
    %c0_i32_1 = arith.constant 0 : i32
    return %c0_i32, %c0_i32_0 : i32, i32
  }
  func.func @transform_2(%arg0: i32) -> (i32, i32) {
    %c0_i32 = arith.constant 0 : i32
    %c0_i32_0 = arith.constant 0 : i32
    %c0_i32_1 = arith.constant 0 : i32
    return %c0_i32, %c0_i32_0 : i32, i32
  }
  func.func @transform_3(%arg0: i32) -> (i32, i32) {
    %c0_i32 = arith.constant 0 : i32
    %c0_i32_0 = arith.constant 0 : i32
    %c0_i32_1 = arith.constant 0 : i32
    return %c0_i32, %c0_i32_0 : i32, i32
  }
  func.func @transform_4(%arg0: i32) -> (i32, i32, i32, i32) {
    %c0_i32 = arith.constant 0 : i32
    %c0_i32_0 = arith.constant 0 : i32
    %c0_i32_1 = arith.constant 0 : i32
    %c0_i32_2 = arith.constant 0 : i32
    return %arg0, %c0_i32, %c0_i32_0, %c0_i32_1 : i32, i32, i32, i32
  }
}

module attributes {stable_mosaic.version = 11 : i64} {
  func.func @_patch_expand_fused_kernel(%arg0: i32, %arg1: memref<64x32xf32, #tpu.memory_space<vmem>>, %arg2: memref<32x64xf32, #tpu.memory_space<vmem>>, %arg3: memref<1x16xf32, #tpu.memory_space<vmem>>, %arg4: memref<1x16xf32, #tpu.memory_space<vmem>>, %arg5: memref<8x2x8x32xf32, #tpu.memory_space<vmem>>) attributes {dimension_semantics = [#tpu.dimension_semantics<parallel>], iteration_bounds = array<i64: 2>, scalar_prefetch = 0 : i64, scratch_operands = 0 : i64, tpu.core_type = #tpu.core_type<tc>, window_params = [{transform_indices = @transform_0, window_bounds = array<i64: 64, 32>}, {pipeline_mode = #tpu.pipeline_mode<synchronous>, transform_indices = @transform_1, window_bounds = array<i64: 32, 64>}, {pipeline_mode = #tpu.pipeline_mode<synchronous>, transform_indices = @transform_2, window_bounds = array<i64: 1, 16>}, {pipeline_mode = #tpu.pipeline_mode<synchronous>, transform_indices = @transform_3, window_bounds = array<i64: 1, 16>}, {transform_indices = @transform_4, window_bounds = array<i64: 8, 2, 8, 32>}]} {
    %c0 = arith.constant 0 : index
    %c0_0 = arith.constant 0 : index
    %0 = vector.load %arg1[%c0, %c0_0] : memref<64x32xf32, #tpu.memory_space<vmem>>, vector<64x32xf32>
    %c0_1 = arith.constant 0 : index
    %c0_2 = arith.constant 0 : index
    %1 = vector.load %arg3[%c0_1, %c0_2] : memref<1x16xf32, #tpu.memory_space<vmem>>, vector<1x16xf32>
    %c0_3 = arith.constant 0 : index
    %c0_4 = arith.constant 0 : index
    %2 = vector.load %arg4[%c0_3, %c0_4] : memref<1x16xf32, #tpu.memory_space<vmem>>, vector<1x16xf32>
    %c0_5 = arith.constant 0 : index
    %c0_6 = arith.constant 0 : index
    %3 = vector.load %arg2[%c0_5, %c0_6] : memref<32x64xf32, #tpu.memory_space<vmem>>, vector<32x32xf32>
    %cst = arith.constant dense<0.000000e+00> : vector<64x32xf32>
    %4 = tpu.matmul %0, %3, %cst {dimension_numbers = #tpu.dot_dimension_numbers<[1], [0], [0], [1], [0, 0, 1, 1], [], []>} : vector<64x32xf32>, vector<32x32xf32>, vector<64x32xf32> -> vector<64x32xf32>
    %5 = vector.extract_strided_slice %4 {offsets = [0, 0], sizes = [64, 16], strides = [1, 1]} : vector<64x32xf32> to vector<64x16xf32>
    %cst_7 = arith.constant dense<0.000000e+00> : vector<64xf32>
    %6 = vector.multi_reduction <add>, %5, %cst_7 [1] : vector<64x16xf32> to vector<64xf32>
    %7 = vector.shape_cast %6 : vector<64xf32> to vector<64x1xf32>
    %cst_8 = arith.constant 1.600000e+01 : f32
    %8 = vector.broadcast %cst_8 : f32 to vector<64x1xf32>
    %9 = arith.divf %7, %8 : vector<64x1xf32>
    %10 = vector.broadcast %9 : vector<64x1xf32> to vector<64x16xf32>
    %11 = arith.subf %5, %10 : vector<64x16xf32>
    %12 = arith.mulf %11, %11 : vector<64x16xf32>
    %cst_9 = arith.constant dense<0.000000e+00> : vector<64xf32>
    %13 = vector.multi_reduction <add>, %12, %cst_9 [1] : vector<64x16xf32> to vector<64xf32>
    %14 = vector.shape_cast %13 : vector<64xf32> to vector<64x1xf32>
    %cst_10 = arith.constant 1.600000e+01 : f32
    %15 = vector.broadcast %cst_10 : f32 to vector<64x1xf32>
    %16 = arith.divf %14, %15 : vector<64x1xf32>
    %cst_11 = arith.constant 9.99999974E-6 : f32
    %17 = vector.broadcast %cst_11 : f32 to vector<64x1xf32>
    %18 = arith.addf %16, %17 : vector<64x1xf32>
    %19 = math.rsqrt %18 : vector<64x1xf32>
    %20 = vector.broadcast %19 : vector<64x1xf32> to vector<64x16xf32>
    %21 = arith.mulf %11, %20 : vector<64x16xf32>
    %22 = vector.broadcast %1 : vector<1x16xf32> to vector<64x16xf32>
    %23 = arith.mulf %21, %22 : vector<64x16xf32>
    %24 = vector.broadcast %2 : vector<1x16xf32> to vector<64x16xf32>
    %25 = arith.addf %23, %24 : vector<64x16xf32>
    %26 = vector.extract_strided_slice %4 {offsets = [0, 16], sizes = [64, 16], strides = [1, 1]} : vector<64x32xf32> to vector<64x16xf32>
    %cst_12 = arith.constant dense<0.000000e+00> : vector<64xf32>
    %27 = vector.multi_reduction <add>, %26, %cst_12 [1] : vector<64x16xf32> to vector<64xf32>
    %28 = vector.shape_cast %27 : vector<64xf32> to vector<64x1xf32>
    %cst_13 = arith.constant 1.600000e+01 : f32
    %29 = vector.broadcast %cst_13 : f32 to vector<64x1xf32>
    %30 = arith.divf %28, %29 : vector<64x1xf32>
    %31 = vector.broadcast %30 : vector<64x1xf32> to vector<64x16xf32>
    %32 = arith.subf %26, %31 : vector<64x16xf32>
    %33 = arith.mulf %32, %32 : vector<64x16xf32>
    %cst_14 = arith.constant dense<0.000000e+00> : vector<64xf32>
    %34 = vector.multi_reduction <add>, %33, %cst_14 [1] : vector<64x16xf32> to vector<64xf32>
    %35 = vector.shape_cast %34 : vector<64xf32> to vector<64x1xf32>
    %cst_15 = arith.constant 1.600000e+01 : f32
    %36 = vector.broadcast %cst_15 : f32 to vector<64x1xf32>
    %37 = arith.divf %35, %36 : vector<64x1xf32>
    %cst_16 = arith.constant 9.99999974E-6 : f32
    %38 = vector.broadcast %cst_16 : f32 to vector<64x1xf32>
    %39 = arith.addf %37, %38 : vector<64x1xf32>
    %40 = math.rsqrt %39 : vector<64x1xf32>
    %41 = vector.broadcast %40 : vector<64x1xf32> to vector<64x16xf32>
    %42 = arith.mulf %32, %41 : vector<64x16xf32>
    %43 = vector.broadcast %1 : vector<1x16xf32> to vector<64x16xf32>
    %44 = arith.mulf %42, %43 : vector<64x16xf32>
    %45 = vector.broadcast %2 : vector<1x16xf32> to vector<64x16xf32>
    %46 = arith.addf %44, %45 : vector<64x16xf32>
    %47 = tpu.concatenate %25, %46 in 1 : vector<64x16xf32>, vector<64x16xf32> -> vector<64x32xf32>
    %48 = vector.shape_cast %47 : vector<64x32xf32> to vector<8x1x8x32xf32>
    %c0_17 = arith.constant 0 : index
    %c0_18 = arith.constant 0 : index
    %c0_19 = arith.constant 0 : index
    %c0_20 = arith.constant 0 : index
    %49 = vector.load %arg5[%c0_17, %c0_18, %c0_19, %c0_20] : memref<8x2x8x32xf32, #tpu.memory_space<vmem>>, vector<8x1x8x32xf32>
    tpu.vector_store %arg5[%c0_17, %c0_18, %c0_19, %c0_20], %48 {strides = array<i32>} : memref<8x2x8x32xf32, #tpu.memory_space<vmem>>, vector<8x1x8x32xf32>,
    %c0_21 = arith.constant 0 : index
    %c32 = arith.constant 32 : index
    %50 = vector.load %arg2[%c0_21, %c32] : memref<32x64xf32, #tpu.memory_space<vmem>>, vector<32x32xf32>
    %cst_22 = arith.constant dense<0.000000e+00> : vector<64x32xf32>
    %51 = tpu.matmul %0, %50, %cst_22 {dimension_numbers = #tpu.dot_dimension_numbers<[1], [0], [0], [1], [0, 0, 1, 1], [], []>} : vector<64x32xf32>, vector<32x32xf32>, vector<64x32xf32> -> vector<64x32xf32>
    %52 = vector.extract_strided_slice %51 {offsets = [0, 0], sizes = [64, 16], strides = [1, 1]} : vector<64x32xf32> to vector<64x16xf32>
    %cst_23 = arith.constant dense<0.000000e+00> : vector<64xf32>
    %53 = vector.multi_reduction <add>, %52, %cst_23 [1] : vector<64x16xf32> to vector<64xf32>
    %54 = vector.shape_cast %53 : vector<64xf32> to vector<64x1xf32>
    %cst_24 = arith.constant 1.600000e+01 : f32
    %55 = vector.broadcast %cst_24 : f32 to vector<64x1xf32>
    %56 = arith.divf %54, %55 : vector<64x1xf32>
    %57 = vector.broadcast %56 : vector<64x1xf32> to vector<64x16xf32>
    %58 = arith.subf %52, %57 : vector<64x16xf32>
    %59 = arith.mulf %58, %58 : vector<64x16xf32>
    %cst_25 = arith.constant dense<0.000000e+00> : vector<64xf32>
    %60 = vector.multi_reduction <add>, %59, %cst_25 [1] : vector<64x16xf32> to vector<64xf32>
    %61 = vector.shape_cast %60 : vector<64xf32> to vector<64x1xf32>
    %cst_26 = arith.constant 1.600000e+01 : f32
    %62 = vector.broadcast %cst_26 : f32 to vector<64x1xf32>
    %63 = arith.divf %61, %62 : vector<64x1xf32>
    %cst_27 = arith.constant 9.99999974E-6 : f32
    %64 = vector.broadcast %cst_27 : f32 to vector<64x1xf32>
    %65 = arith.addf %63, %64 : vector<64x1xf32>
    %66 = math.rsqrt %65 : vector<64x1xf32>
    %67 = vector.broadcast %66 : vector<64x1xf32> to vector<64x16xf32>
    %68 = arith.mulf %58, %67 : vector<64x16xf32>
    %69 = vector.broadcast %1 : vector<1x16xf32> to vector<64x16xf32>
    %70 = arith.mulf %68, %69 : vector<64x16xf32>
    %71 = vector.broadcast %2 : vector<1x16xf32> to vector<64x16xf32>
    %72 = arith.addf %70, %71 : vector<64x16xf32>
    %73 = vector.extract_strided_slice %51 {offsets = [0, 16], sizes = [64, 16], strides = [1, 1]} : vector<64x32xf32> to vector<64x16xf32>
    %cst_28 = arith.constant dense<0.000000e+00> : vector<64xf32>
    %74 = vector.multi_reduction <add>, %73, %cst_28 [1] : vector<64x16xf32> to vector<64xf32>
    %75 = vector.shape_cast %74 : vector<64xf32> to vector<64x1xf32>
    %cst_29 = arith.constant 1.600000e+01 : f32
    %76 = vector.broadcast %cst_29 : f32 to vector<64x1xf32>
    %77 = arith.divf %75, %76 : vector<64x1xf32>
    %78 = vector.broadcast %77 : vector<64x1xf32> to vector<64x16xf32>
    %79 = arith.subf %73, %78 : vector<64x16xf32>
    %80 = arith.mulf %79, %79 : vector<64x16xf32>
    %cst_30 = arith.constant dense<0.000000e+00> : vector<64xf32>
    %81 = vector.multi_reduction <add>, %80, %cst_30 [1] : vector<64x16xf32> to vector<64xf32>
    %82 = vector.shape_cast %81 : vector<64xf32> to vector<64x1xf32>
    %cst_31 = arith.constant 1.600000e+01 : f32
    %83 = vector.broadcast %cst_31 : f32 to vector<64x1xf32>
    %84 = arith.divf %82, %83 : vector<64x1xf32>
    %cst_32 = arith.constant 9.99999974E-6 : f32
    %85 = vector.broadcast %cst_32 : f32 to vector<64x1xf32>
    %86 = arith.addf %84, %85 : vector<64x1xf32>
    %87 = math.rsqrt %86 : vector<64x1xf32>
    %88 = vector.broadcast %87 : vector<64x1xf32> to vector<64x16xf32>
    %89 = arith.mulf %79, %88 : vector<64x16xf32>
    %90 = vector.broadcast %1 : vector<1x16xf32> to vector<64x16xf32>
    %91 = arith.mulf %89, %90 : vector<64x16xf32>
    %92 = vector.broadcast %2 : vector<1x16xf32> to vector<64x16xf32>
    %93 = arith.addf %91, %92 : vector<64x16xf32>
    %94 = tpu.concatenate %72, %93 in 1 : vector<64x16xf32>, vector<64x16xf32> -> vector<64x32xf32>
    %95 = vector.shape_cast %94 : vector<64x32xf32> to vector<8x1x8x32xf32>
    %c0_33 = arith.constant 0 : index
    %c1 = arith.constant 1 : index
    %c0_34 = arith.constant 0 : index
    %c0_35 = arith.constant 0 : index
    %96 = vector.load %arg5[%c0_33, %c1, %c0_34, %c0_35] : memref<8x2x8x32xf32, #tpu.memory_space<vmem>>, vector<8x1x8x32xf32>
    tpu.vector_store %arg5[%c0_33, %c1, %c0_34, %c0_35], %95 {strides = array<i32>} : memref<8x2x8x32xf32, #tpu.memory_space<vmem>>, vector<8x1x8x32xf32>,
    return
  }
  func.func @transform_0(%arg0: i32) -> (i32, i32) {
    %c0_i32 = arith.constant 0 : i32
    %c0_i32_0 = arith.constant 0 : i32
    return %arg0, %c0_i32 : i32, i32
  }
  func.func @transform_1(%arg0: i32) -> (i32, i32) {
    %c0_i32 = arith.constant 0 : i32
    %c0_i32_0 = arith.constant 0 : i32
    %c0_i32_1 = arith.constant 0 : i32
    return %c0_i32, %c0_i32_0 : i32, i32
  }
  func.func @transform_2(%arg0: i32) -> (i32, i32) {
    %c0_i32 = arith.constant 0 : i32
    %c0_i32_0 = arith.constant 0 : i32
    %c0_i32_1 = arith.constant 0 : i32
    return %c0_i32, %c0_i32_0 : i32, i32
  }
  func.func @transform_3(%arg0: i32) -> (i32, i32) {
    %c0_i32 = arith.constant 0 : i32
    %c0_i32_0 = arith.constant 0 : i32
    %c0_i32_1 = arith.constant 0 : i32
    return %c0_i32, %c0_i32_0 : i32, i32
  }
  func.func @transform_4(%arg0: i32) -> (i32, i32, i32, i32) {
    %c0_i32 = arith.constant 0 : i32
    %c0_i32_0 = arith.constant 0 : i32
    %c0_i32_1 = arith.constant 0 : i32
    %c0_i32_2 = arith.constant 0 : i32
    return %arg0, %c0_i32, %c0_i32_0, %c0_i32_1 : i32, i32, i32, i32
  }
}

</mosaic_0001>

<bundles_post_ra>
// kernel: tpu_custom_call.1
= control target key start
LH: loop header
LB: loop body
LE: loop exit
PB: predicated region body
PF: predicated region fallthrough
CT: control target
= control target key end

     0   :  { %9 = vsyncpa [#allocation3], 0  ;;  %s2254_s0 = inlined_call_operand.vmem [shape: f32[128,32], index: 0, kind: input, shape index: {}]   ;;  %s2255_s1 = inlined_call_operand.vmem [shape: f32[32,64], index: 1, kind: input, shape index: {}]   ;;  %s2256_s2 = inlined_call_operand.vmem [shape: f32[1,16], index: 2, kind: input, shape index: {}]   ;;  %s2257_s3 = inlined_call_operand.vmem [shape: f32[1,16], index: 3, kind: input, shape index: {}]   ;;  %s2258_s4 = inlined_call_operand.hbm [shape: f32[16,2,8,32], index: 4, kind: output, shape index: {}]  }
   0x1   :  { %11 = vsyncpa [#allocation3 + $0x1], 0  ;;  %s1512_s15 = smov 0   ;;  %s1514_s16 = smov 0  }
   0x2   :  { %s1516_s17 = smov 0   ;;  %s1518_s18 = smov 0  }
   0x3 LB: > { %s1533_s19 = sadd.s32 4294967295, %s1479_s18   ;;  %s1206_s20 = sadd.s32 4294967294, %s1479_s18   ;;  %s1479_s18 = sphi %s1518_s18, %s2285_s18   ;;  %s1475_s17 = sphi %s1516_s17, %s2284_s17   ;;  %s1471_s16 = sphi %s1514_s16, %s2283_s16   ;;  %s1467_s15 = sphi %s1512_s15, %s2282_s15  }
   0x4   : > { %s1537_s21 = sadd.s32 1, %s1479_s18   ;;  %s113_s22 = sadd.s32 1, %s1475_s17 }
   0x5   : > { %s110_s23 = ssub.s32 %s1479_s18, %s1537_s21  ;;  %p123_p0 = scmp.ne.s32.totalorder %s1475_s17, %s1471_s16 }
   0x6   : > { %p111_p1 = scmp.eq.s32.totalorder %s110_s23, 0  ;;  %p124_p2 = scmp.eq.s32.totalorder %s1533_s19, 1 }
   0x7   : > { %p129_p3 = scmp.ne.s32.totalorder %s1471_s16, %s1467_s15  ;;  %p130_p4 = scmp.eq.s32.totalorder %s1206_s20, 1 }
   0x8   : > { %s1548_s24 = scalar_select %p111_p1, %s1475_s17, %s113_s22  }
   0x9   : > { %p1550_p5 = por %p124_p2, %p123_p0  ;;  %p1554_p6 = por %p130_p4, %p129_p3 }
   0xa   : > { %p1209_p7 = scmp.ge.s32.totalorder %s1479_s18, 1  ;;  %p166_p8 = scmp.lt.s32.totalorder %s1479_s18, 3 }
   0xc   : > { %p167_p9 = pnand %p1209_p7, %p166_p8 }
   0xe   : > { %170 = sbr.rel (%p167_p9) target bundleno = 1171 (0x493), region = 36 }
  0x13   : > { %v212_v0 = vld [vmem:[%s2255_s1 + $0x18] sm:$0xff]  ;;  %v211_v1 = vld [vmem:[%s2255_s1 + $0x10] sm:$0xff]  ;;  %s1211_s5 = sshll.u32 %s1533_s19, 3  ;;  %v210_v2 = vld [vmem:[%s2255_s1 + $0x8] sm:$0xff]  ;;  %s1481_s8 = smov 96   ;;  %vm213_vm0 = vcmask 261120  }
  0x14   : > { %1271 = vmatprep.subr.mxu0 %v212_v0  ;;  %p193_p10 = scmp.lt.s32.totalorder %s1211_s5, 15  ;;  %697 = vrot.lane.b32.xlu0 %v212_v0, %s1481_s8  ;;  %v209_v3 = vld [vmem:[%s2255_s1] sm:$0xff]  ;;  %vm343_vm1 = vcmask 130048   ;;  %s1482_s20 = smov 112  }
  0x15   : > { %1272 = vmatpush3.msra.mxu0 %v212_v0  ;;  %693 = vrot.lane.b32.xlu1 %v210_v2, %s1481_s8  ;;  %s1483_s27 = smov 16   ;;  %s189_s30 = sand.u32 1, %s1471_s16  }
  0x16   : > { %1273 = vmatprep.subr.mxu0 %v211_v1  ;;  %s2287_s5 = smov (!%p193_p10, %s1211_s5), 15  ;;  %s1246_s7 = sshll.u32 %s1533_s19, 11 }
  0x17   : > { %1274 = vmatpush3.msra.mxu0 %v211_v1  ;;  %s1212_s11 = sshll.u32 %s2287_s5, 3  ;;  %s1210_s5 = sshll.u32 %s189_s30, 7 }
  0x18   : > { %1275 = vmatprep.subr.mxu0 %v210_v2  ;;  %695 = vrot.lane.b32.xlu0 %v211_v1, %s1481_s8  ;;  %s196_s14 = scalar_lea.vmem %s2254_s0, %s1212_s11  ;;  %s2131_s6 = scalar_lea.vmem [#allocation2], %s1210_s5 }
  0x19   : > { %1276 = vmatpush3.msra.mxu0 %v210_v2  ;;  %691 = vrot.lane.b32.xlu1 %v209_v3, %s1481_s8  ;;  %v199_v4 = vld [vmem:[%s196_s14] sm:$0xff]  ;;  %v200_v5 = vld [vmem:[%s196_s14 + $0x8] sm:$0xff]  ;;  %v201_v6 = vld [vmem:[%s196_s14 + $0x10] sm:$0xff]  ;;  %s1144_s8 = sshll.u32 %s2131_s6, 4  ;;  %s2205_s11 = scalar_lea.hbm %s2258_s4, %s1246_s7  ;;  %s2207_s8 = int_to_ptr.vmem [resolvable:$true] %s1144_s8 }
  0x1a   : > { %1277 = vmatprep.subr.mxu0 %v209_v3  ;;  %1279 = vmatprep.mubr.msk.f32.mxu0 %vm213_vm0, %v199_v4  ;;  %v202_v7 = vld [vmem:[%s196_s14 + $0x18] sm:$0xff]  ;;  %v203_v8 = vld [vmem:[%s196_s14 + $0x20] sm:$0xff]  ;;  %v204_v9 = vld [vmem:[%s196_s14 + $0x28] sm:$0xff]  ;;  %s2214_s19 = scalar_lea.sflag [#allocation3], %s189_s30  ;;  %s1419_s12 = scalar_lea.vmem %s2207_s8, 2048 }
  0x1b   : > { %1278 = vmatpush3.msra.mxu0 %v209_v3  ;;  %1299 = vmatprep.mubr.msk.f32.mxu1 %vm213_vm0, %v199_v4  ;;  %v205_v10 = vld [vmem:[%s196_s14 + $0x30] sm:$0xff]  ;;  %v206_v11 = vld [vmem:[%s196_s14 + $0x38] sm:$0xff]  ;;  %p1420_p11 = scmp.ne.s32.totalorder %s2207_s8, %s1419_s12  ;;  %s1484_s13 = smov [#allocation2]  }
  0x1c   : > { %1280 = vmatmul.mubr.msk.f32.vlgmr.msra.gmra.mxu0 %vm213_vm0, %v200_v5  ;;  %s1423_s14 = sshll.u32 %s1484_s13, 4  ;;  %s1424_s14 = int_to_ptr.vmem [resolvable:$false] %s1423_s14 }
  0x1d   : > { %1282 = vmatprep.mubr.msk.f32.mxu0 %vm213_vm0, %v201_v6  ;;  %p1421_p12 = pnand %p1420_p11, %p1550_p5  ;;  %p1426_p0 = scmp.lt.s32.totalorder %s2207_s8, %s1424_s14 }
  0x1f   : > { %p1422_p13 = pneg %p1421_p12 }
  0x20   : > { %1283 = vmatmul.mubr.msk.f32.gmra.mxu0 %vm213_vm0, %v202_v7 }
  0x21   : > { %1285 = vmatprep.mubr.msk.f32.mxu0 %vm213_vm0, %v203_v8 }
  0x24   : > { %1286 = vmatmul.mubr.msk.f32.gmra.mxu0 %vm213_vm0, %v204_v9 }
  0x25   : > { %1288 = vmatprep.mubr.msk.f32.mxu0 %vm213_vm0, %v205_v10 }
  0x28   : > { %1289 = vmatmul.mubr.msk.f32.gmra.mxu0 %vm213_vm0, %v206_v11 }
  0x86   : > { %v698_v12 = vpop.permute.xlu0 %697 }
  0x87   : > { %1291 = vmatprep.subr.mxu1 %v698_v12  ;;  %v694_v13 = vpop.permute.xlu1 %693 }
  0x88   : > { %1292 = vmatpush3.msra.mxu1 %v698_v12 }
  0x8a   : > { %v696_v14 = vpop.permute.xlu0 %695 }
  0x8b   : > { %1293 = vmatprep.subr.mxu1 %v696_v14  ;;  %v692_v15 = vpop.permute.xlu1 %691 }
  0x8c   : > { %1294 = vmatpush3.msra.mxu1 %v696_v14 }
  0x8d   : > { %1295 = vmatprep.subr.mxu1 %v694_v13 }
  0x8e   : > { %1296 = vmatpush3.msra.mxu1 %v694_v13 }
  0x8f   : > { %1297 = vmatprep.subr.mxu1 %v692_v15 }
  0x90   : > { %1298 = vmatpush3.msra.mxu1 %v692_v15 }
  0x91   : > { %1300 = vmatmul.mubr.msk.f32.vlgmr.msra.gmra.mxu1 %vm213_vm0, %v200_v5 }
  0x92   : > { %1302 = vmatprep.mubr.msk.f32.mxu1 %vm213_vm0, %v201_v6 }
  0x95   : > { %1303 = vmatmul.mubr.msk.f32.gmra.mxu1 %vm213_vm0, %v202_v7 }
  0x96   : > { %1305 = vmatprep.mubr.msk.f32.mxu1 %vm213_vm0, %v203_v8 }
  0x99   : > { %1306 = vmatmul.mubr.msk.f32.gmra.mxu1 %vm213_vm0, %v204_v9 }
  0x9a   : > { %1308 = vmatprep.mubr.msk.f32.mxu1 %vm213_vm0, %v205_v10 }
  0x9d   : > { %1309 = vmatmul.mubr.msk.f32.gmra.mxu1 %vm213_vm0, %v206_v11 }
  0xdc   : > { %v1592_v16 = vpop.f32.mrf.mxu0 }
  0xdd   : > { %487 = vrot.lane.b32.xlu0 %v1592_v16, %s1482_s20  ;;  %v347_v17 = vsel %vm343_vm1, %v1592_v16, 0.0 }
  0xde   : > { %348 = vadd.xlane.f32.xlu1 %v347_v17  ;;  %v1598_v18 = vpop.f32.mrf.mxu0 }
  0xdf   : > { %v344_v22 = vsel %vm343_vm1, %v1598_v18, 0.0 }
  0xe0   : > { %v1602_v19 = vpop.f32.mrf.mxu0 }
  0xe1   : > { %v353_v23 = vsel %vm343_vm1, %v1602_v19, 0.0 }
  0xe2   : > { %v1606_v20 = vpop.f32.mrf.mxu0 }
  0xe3   : > { %v350_v24 = vsel %vm343_vm1, %v1606_v20, 0.0 }
  0xe4   : > { %v1610_v21 = vpop.f32.mrf.mxu0 }
  0xe5   : > { %v359_v26 = vsel %vm343_vm1, %v1610_v21, 0.0 }
  0xe6   : > { %v1620_v25 = vpop.f32.mrf.mxu0 }
  0xe7   : > { %v356_v28 = vsel %vm343_vm1, %v1620_v25, 0.0 }
  0xe8   : > { %v1626_v27 = vpop.f32.mrf.mxu0 }
  0xe9   : > { %v365_v29 = vsel %vm343_vm1, %v1626_v27, 0.0 }
  0xea   : > { %v1634_v30 = vpop.f32.mrf.mxu0 }
  0xeb   : > { %v362_v31 = vsel %vm343_vm1, %v1634_v30, 0.0 }
  0xef   : > { %485 = vrot.lane.b32.xlu1 %v1598_v18, %s1482_s20 }
  0xf3   : > { %491 = vrot.lane.b32.xlu1 %v1602_v19, %s1482_s20 }
  0xf7   : > { %489 = vrot.lane.b32.xlu1 %v1606_v20, %s1482_s20 }
  0xfb   : > { %495 = vrot.lane.b32.xlu1 %v1610_v21, %s1482_s20 }
  0xfc   : > { %345 = vadd.xlane.f32.xlu0 %v344_v22 }
 0x100   : > { %354 = vadd.xlane.f32.xlu0 %v353_v23 }
 0x104   : > { %351 = vadd.xlane.f32.xlu0 %v350_v24 }
 0x11a   : > { %493 = vrot.lane.b32.xlu0 %v1620_v25, %s1482_s20 }
 0x11f   : > { %360 = vadd.xlane.f32.xlu1 %v359_v26 }
 0x130   : > { %499 = vrot.lane.b32.xlu1 %v1626_v27, %s1482_s20 }
 0x139   : > { %357 = vadd.xlane.f32.xlu0 %v356_v28 }
 0x13d   : > { %366 = vadd.xlane.f32.xlu0 %v365_v29 }
 0x14f   : > { %v488_v35 = vpop.permute.xlu0 %487 }
 0x150   : > { %v512_v36 = vsel %vm343_vm1, %v488_v35, 0.0 }
 0x151   : > { %v1640_v32 = vpop.f32.mrf.mxu1 }
 0x152   : > { %v811_v37 = vsel %vm343_vm1, %v1640_v32, 0.0 }
 0x153   : > { %497 = vrot.lane.b32.xlu0 %v1634_v30, %s1482_s20  ;;  %v1642_v33 = vpop.f32.mrf.mxu1 }
 0x154   : > { %363 = vadd.xlane.f32.xlu1 %v362_v31  ;;  %v808_v47 = vsel %vm343_vm1, %v1642_v33, 0.0 }
 0x155   : > { %v1646_v34 = vpop.f32.mrf.mxu1 }
 0x156   : > { %v817_v50 = vsel %vm343_vm1, %v1646_v34, 0.0 }
 0x157   : > { %v1658_v43 = vpop.f32.mrf.mxu1 }
 0x158   : > { %v814_v58 = vsel %vm343_vm1, %v1658_v43, 0.0 }
 0x159   : > { %v1660_v44 = vpop.f32.mrf.mxu1 }
 0x15a   : > { %v823_v62 = vsel %vm343_vm1, %v1660_v44, 0.0 }
 0x15b   : > { %v1672_v53 = vpop.f32.mrf.mxu1 }
 0x15c   : > { %v820_v55 = vsel %vm343_vm1, %v1672_v53, 0.0 }
 0x15d   : > { %v1679_v56 = vpop.f32.mrf.mxu1 }
 0x165   : > { %938 = vrot.lane.b32.xlu1 %v1640_v32, %s1482_s20 }
 0x167   : > { %v1653_v38 = vpop.xlane.xlu1 %348 }
 0x169   : > { %942 = vrot.lane.b32.xlu1 %v1646_v34, %s1482_s20 }
 0x16b   : > { %v486_v39 = vpop.permute.xlu1 %485 }
 0x16c   : > { %v509_v45 = vsel %vm343_vm1, %v486_v39, 0.0 }
 0x16f   : > { %v492_v40 = vpop.permute.xlu1 %491 }
 0x170   : > { %v518_v49 = vsel %vm343_vm1, %v492_v40, 0.0 }
 0x172   : > { %513 = vadd.xlane.f32.xlu0 %v512_v36  ;;  %v829_v36 = vsel %vm343_vm1, %v1679_v56, 0.0 }
 0x173   : > { %v490_v41 = vpop.permute.xlu1 %489 }
 0x174   : > { %v515_v42 = vsel %vm343_vm1, %v490_v41, 0.0 }
 0x176   : > { %812 = vadd.xlane.f32.xlu0 %v811_v37 }
 0x177   : > { %v496_v59 = vpop.permute.xlu1 %495 }
 0x178   : > { %v524_v60 = vsel %vm343_vm1, %v496_v59, 0.0 }
 0x185   : > { %v346_v46 = vpop.xlane.xlu0 %345 }
 0x186   : > { %v369_v63 = vmul.f32 0.0625, %v346_v46 }
 0x188   : > { %v1689_v1 = vsub.f32 %v1598_v18, %v369_v63 }
 0x189   : > { %v1667_v48 = vpop.xlane.xlu0 %354 }
 0x18a   : > { %v385_v8 = vmul.f32 %v1689_v1, %v1689_v1 }
 0x18c   : > { %936 = vrot.lane.b32.xlu0 %v1642_v33, %s1482_s20  ;;  %v393_v12 = vsel %vm343_vm1, %v385_v8, 0.0 }
 0x18d   : > { %516 = vadd.xlane.f32.xlu1 %v515_v42  ;;  %v352_v51 = vpop.xlane.xlu0 %351  ;;  %v1731_v42 = vpop.f32.mrf.mxu1 }
 0x18e   : > { %v371_v2 = vmul.f32 0.0625, %v352_v51 }
 0x190   : > { %v1692_v5 = vsub.f32 %v1606_v20, %v371_v2 }
 0x191   : > { %v494_v52 = vpop.permute.xlu0 %493 }
 0x192   : > { %v521_v54 = vsel %vm343_vm1, %v494_v52, 0.0  ;;  %v387_v13 = vmul.f32 %v1692_v5, %v1692_v5 }
 0x194   : > { %v399_v17 = vsel %vm343_vm1, %v387_v13, 0.0 }
 0x19e   : > { %946 = vrot.lane.b32.xlu1 %v1660_v44, %s1482_s20 }
 0x1a8   : > { %v361_v0 = vpop.xlane.xlu1 %360 }
 0x1ab   : > { %510 = vadd.xlane.f32.xlu0 %v509_v45 }
 0x1ac   : > { %v500_v3 = vpop.permute.xlu1 %499 }
 0x1ad   : > { %v530_v35 = vsel %vm343_vm1, %v500_v3, 0.0 }
 0x1af   : > { %809 = vadd.xlane.f32.xlu0 %v808_v47  ;;  %v370_v47 = vmul.f32 0.0625, %v1653_v38 }
 0x1b3   : > { %519 = vadd.xlane.f32.xlu0 %v518_v49  ;;  %v1738_v49 = vsub.f32 %v1592_v16, %v370_v47 }
 0x1b7   : > { %818 = vadd.xlane.f32.xlu0 %v817_v50  ;;  %v372_v50 = vmul.f32 0.0625, %v1667_v48 }
 0x1b9   : > { %v1742_v52 = vsub.f32 %v1602_v19, %v372_v50 }
 0x1bb   : > { %v388_v48 = vmul.f32 %v1742_v52, %v1742_v52 }
 0x1c2   : > { %522 = vadd.xlane.f32.xlu1 %v521_v54  ;;  %v358_v57 = vpop.xlane.xlu0 %357  ;;  %v374_v54 = vmul.f32 0.0625, %v361_v0  ;;  %v402_v0 = vsel %vm343_vm1, %v388_v48, 0.0 }
 0x1c3   : > { %v373_v6 = vmul.f32 0.0625, %v358_v57  ;;  %v386_v57 = vmul.f32 %v1738_v49, %v1738_v49 }
 0x1c4   : > { %v1749_v38 = vsub.f32 %v1610_v21, %v374_v54 }
 0x1c5   : > { %v1698_v10 = vsub.f32 %v1620_v25, %v373_v6 }
 0x1c6   : > { %821 = vadd.xlane.f32.xlu1 %v820_v55  ;;  %v367_v61 = vpop.xlane.xlu0 %366  ;;  %v826_v55 = vsel %vm343_vm1, %v1731_v42, 0.0  ;;  %v390_v2 = vmul.f32 %v1749_v38, %v1749_v38 }
 0x1c7   : > { %v389_v22 = vmul.f32 %v1698_v10, %v1698_v10  ;;  %v376_v59 = vmul.f32 0.0625, %v367_v61 }
 0x1c9   : > { %v405_v24 = vsel %vm343_vm1, %v389_v22, 0.0  ;;  %v1755_v63 = vsub.f32 %v1626_v27, %v376_v59 }
 0x1ca   : > { %v498_v4 = vpop.permute.xlu0 %497 }
 0x1cb   : > { %v527_v7 = vsel %vm343_vm1, %v498_v4, 0.0  ;;  %v408_v4 = vsel %vm343_vm1, %v390_v2, 0.0  ;;  %v392_v61 = vmul.f32 %v1755_v63, %v1755_v63 }
 0x1cd   : > { %940 = vrot.lane.b32.xlu0 %v1658_v43, %s1482_s20  ;;  %v414_v6 = vsel %vm343_vm1, %v392_v61, 0.0 }
 0x1d7   : > { %950 = vrot.lane.b32.xlu1 %v1679_v56, %s1482_s20 }
 0x1dd   : > { %v364_v9 = vpop.xlane.xlu1 %363 }
 0x1de   : > { %v375_v11 = vmul.f32 0.0625, %v364_v9 }
 0x1e0   : > { %v1706_v15 = vsub.f32 %v1634_v30, %v375_v11 }
 0x1e1   : > { %v939_v51 = vpop.permute.xlu1 %938 }
 0x1e2   : > { %v391_v26 = vmul.f32 %v1706_v15, %v1706_v15  ;;  %v963_v9 = vsel %vm343_vm1, %v939_v51, 0.0 }
 0x1e4   : > { %v411_v28 = vsel %vm343_vm1, %v391_v26, 0.0 }
 0x1ec   : > { %815 = vadd.xlane.f32.xlu0 %v814_v58  ;;  %v943_v58 = vpop.permute.xlu1 %942 }
 0x1ed   : > { %v969_v13 = vsel %vm343_vm1, %v943_v58, 0.0 }
 0x1f0   : > { %525 = vadd.xlane.f32.xlu0 %v524_v60  ;;  %v396_v60 = vsel %vm343_vm1, %v386_v57, 0.0 }
 0x1f4   : > { %824 = vadd.xlane.f32.xlu0 %v823_v62 }
 0x1fb   : > { %528 = vadd.xlane.f32.xlu1 %v527_v7  ;;  %v1703_v14 = vpop.xlane.xlu0 %513 }
 0x1ff   : > { %394 = vadd.xlane.f32.xlu1 %v393_v12  ;;  %v1711_v23 = vpop.xlane.xlu0 %812 }
 0x203   : > { %400 = vadd.xlane.f32.xlu1 %v399_v17  ;;  %v937_v29 = vpop.permute.xlu0 %936 }
 0x204   : > { %v960_v31 = vsel %vm343_vm1, %v937_v29, 0.0 }
 0x207   : > { %406 = vadd.xlane.f32.xlu1 %v405_v24 }
 0x20a   : > { %944 = vrot.lane.b32.xlu0 %v1672_v53, %s1482_s20 }
 0x20b   : > { %412 = vadd.xlane.f32.xlu1 %v411_v28 }
 0x20f   : > { %961 = vadd.xlane.f32.xlu1 %v960_v31  ;;  %v534_v31 = vmul.f32 0.0625, %v1703_v14 }
 0x216   : > { %v517_v62 = vpop.xlane.xlu1 %516 }
 0x21a   : > { %v947_v3 = vpop.permute.xlu1 %946 }
 0x21b   : > { %v975_v24 = vsel %vm343_vm1, %v947_v3, 0.0 }
 0x229   : > { %531 = vadd.xlane.f32.xlu0 %v530_v35  ;;  %v1777_v35 = vsub.f32 %v1592_v16, %v534_v31 }
 0x22b   : > { %v550_v47 = vmul.f32 %v1777_v35, %v1777_v35 }
 0x22d   : > { %830 = vadd.xlane.f32.xlu0 %v829_v36  ;;  %v535_v36 = vmul.f32 0.0625, %v517_v62 }
 0x234   : > { %v1723_v37 = vpop.xlane.xlu0 %510 }
 0x238   : > { %v1725_v39 = vpop.xlane.xlu0 %809 }
 0x23c   : > { %v1727_v40 = vpop.xlane.xlu0 %519 }
 0x240   : > { %v1729_v41 = vpop.xlane.xlu0 %818 }
 0x243   : > { %948 = vrot.lane.b32.xlu0 %v1731_v42, %s1482_s20 }
 0x244   : > { %v941_v45 = vpop.permute.xlu0 %940 }
 0x245   : > { %v966_v46 = vsel %vm343_vm1, %v941_v45, 0.0  ;;  %v1780_v45 = vsub.f32 %v1606_v20, %v535_v36 }
 0x246   : > { %967 = vadd.xlane.f32.xlu1 %v966_v46 }
 0x247   : > { %v551_v14 = vmul.f32 %v1780_v45, %v1780_v45 }
 0x24b   : > { %v523_v7 = vpop.xlane.xlu1 %522 }
 0x24c   : > { %v537_v50 = vmul.f32 0.0625, %v523_v7  ;;  %v536_v7 = vmul.f32 0.0625, %v1727_v40 }
 0x24e   : > { %v1792_v16 = vsub.f32 %v1620_v25, %v537_v50 }
 0x24f   : > { %v1767_v11 = vpop.xlane.xlu1 %821 }
 0x250   : > { %v553_v54 = vmul.f32 %v1792_v16, %v1792_v16 }
 0x253   : > { %v951_v17 = vpop.permute.xlu1 %950 }
 0x254   : > { %v981_v26 = vsel %vm343_vm1, %v951_v17, 0.0 }
 0x262   : > { %827 = vadd.xlane.f32.xlu0 %v826_v55 }
 0x266   : > { %397 = vadd.xlane.f32.xlu0 %v396_v60 }
 0x26a   : > { %403 = vadd.xlane.f32.xlu0 %v402_v0 }
 0x26e   : > { %409 = vadd.xlane.f32.xlu0 %v408_v4 }
 0x272   : > { %415 = vadd.xlane.f32.xlu0 %v414_v6 }
 0x275   : > { %v1764_v8 = vpop.xlane.xlu0 %815 }
 0x276   : > { %964 = vadd.xlane.f32.xlu0 %v963_v9 }
 0x279   : > { %v526_v12 = vpop.xlane.xlu0 %525 }
 0x27a   : > { %970 = vadd.xlane.f32.xlu0 %v969_v13  ;;  %v538_v46 = vmul.f32 0.0625, %v526_v12  ;;  %v1829_v12 = vsub.f32 %v1602_v19, %v536_v7 }
 0x27c   : > { %v1786_v51 = vsub.f32 %v1610_v21, %v538_v46 }
 0x27d   : > { %v1770_v22 = vpop.xlane.xlu0 %824 }
 0x27e   : > { %976 = vadd.xlane.f32.xlu0 %v975_v24  ;;  %v554_v20 = vmul.f32 %v1786_v51, %v1786_v51 }
 0x281   : > { %v945_v28 = vpop.permute.xlu0 %944 }
 0x282   : > { %982 = vadd.xlane.f32.xlu0 %v981_v26  ;;  %v972_v29 = vsel %vm343_vm1, %v945_v28, 0.0 }
 0x283   : > { %973 = vadd.xlane.f32.xlu1 %v972_v29 }
 0x284   : > { %v529_v21 = vpop.xlane.xlu1 %528 }
 0x285   : > { %v539_v58 = vmul.f32 0.0625, %v529_v21 }
 0x287   : > { %v1810_v62 = vsub.f32 %v1634_v30, %v539_v58  ;;  %v533_v30 = vmul.f32 0.0625, %v1723_v37  ;;  %v552_v37 = vmul.f32 %v1829_v12, %v1829_v12 }
 0x288   : > { %v1800_v55 = vpop.xlane.xlu1 %394 }
 0x289   : > { %v555_v4 = vmul.f32 %v1810_v62, %v1810_v62  ;;  %v1825_v6 = vsub.f32 %v1598_v18, %v533_v30 }
 0x28b   : > { %v549_v17 = vmul.f32 %v1825_v6, %v1825_v6 }
 0x28c   : > { %v1805_v25 = vpop.xlane.xlu1 %400 }
 0x298   : > { %567 = vrot.lane.b32.xlu0 %v550_v47, %s1482_s20 }
 0x29c   : > { %569 = vrot.lane.b32.xlu0 %v551_v14, %s1482_s20 }
 0x2a0   : > { %575 = vrot.lane.b32.xlu0 %v554_v20, %s1482_s20 }
 0x2a4   : > { %573 = vrot.lane.b32.xlu0 %v553_v54, %s1482_s20 }
 0x2b2   : > { %v532_v57 = vpop.xlane.xlu0 %531 }
 0x2b3   : > { %v540_v59 = vmul.f32 0.0625, %v532_v57 }
 0x2b5   : > { %v1803_v60 = vsub.f32 %v1626_v27, %v540_v59  ;;  %v1818_v27 = vpop.xlane.xlu1 %406 }
 0x2b6   : > { %v1807_v48 = vpop.xlane.xlu0 %830 }
 0x2b7   : > { %v556_v0 = vmul.f32 %v1803_v60, %v1803_v60 }
 0x2b9   : > { %579 = vrot.lane.b32.xlu0 %v556_v0, %s1482_s20  ;;  %v1821_v61 = vpop.xlane.xlu1 %412 }
 0x2ba   : > { %v949_v2 = vpop.permute.xlu0 %948 }
 0x2bb   : > { %v978_v3 = vsel %vm343_vm1, %v949_v2, 0.0 }
 0x2bc   : > { %979 = vadd.xlane.f32.xlu1 %v978_v3 }
 0x2bd   : > { %577 = vrot.lane.b32.xlu0 %v555_v4, %s1482_s20  ;;  %v962_v9 = vpop.xlane.xlu1 %961 }
 0x2be   : > { %v984_v13 = vmul.f32 0.0625, %v962_v9 }
 0x2c0   : > { %v1835_v24 = vsub.f32 %v1642_v33, %v984_v13 }
 0x2c2   : > { %v1000_v18 = vmul.f32 %v1835_v24, %v1835_v24 }
 0x2cd   : > { %565 = vrot.lane.b32.xlu1 %v549_v17, %s1482_s20 }
 0x2cf   : > { %v968_v4 = vpop.xlane.xlu1 %967 }
 0x2d1   : > { %571 = vrot.lane.b32.xlu1 %v552_v37, %s1482_s20 }
 0x2d5   : > { %1016 = vrot.lane.b32.xlu1 %v1000_v18, %s1482_s20 }
 0x2eb   : > { %v828_v19 = vpop.xlane.xlu0 %827 }
 0x2ef   : > { %v1843_v40 = vpop.xlane.xlu0 %397 }
 0x2f3   : > { %v1845_v26 = vpop.xlane.xlu0 %403 }
 0x2f7   : > { %v1847_v28 = vpop.xlane.xlu0 %409 }
 0x2fb   : > { %v1849_v29 = vpop.xlane.xlu0 %415 }
 0x2ff   : > { %v965_v31 = vpop.xlane.xlu0 %964 }
 0x300   : > { %v985_v36 = vmul.f32 0.0625, %v965_v31  ;;  %v986_v31 = vmul.f32 0.0625, %v968_v4  ;;  %v834_v4 = vmul.f32 0.0625, %v1764_v8 }
 0x302   : > { %v1852_v46 = vsub.f32 %v1640_v32, %v985_v36  ;;  %v1878_v36 = vsub.f32 %v1658_v43, %v986_v31 }
 0x303   : > { %v971_v50 = vpop.xlane.xlu0 %970 }
 0x304   : > { %2268 = vst [vmem:[#allocation5_spill] sm:$0xff] %v1852_v46  ;;  %v1001_v47 = vmul.f32 %v1852_v46, %v1852_v46  ;;  %v987_v57 = vmul.f32 0.0625, %v971_v50  ;;  %2272 = vst [vmem:[#allocation9_spill] sm:$0xff] %v1878_v36 }
 0x306   : > { %1018 = vrot.lane.b32.xlu0 %v1001_v47, %s1482_s20  ;;  %v1859_v58 = vsub.f32 %v1646_v34, %v987_v57  ;;  %v832_v57 = vmul.f32 0.0625, %v1725_v39 }
 0x307   : > { %v977_v14 = vpop.xlane.xlu0 %976 }
 0x308   : > { %2269 = vst [vmem:[#allocation6_spill] sm:$0xff] %v1859_v58  ;;  %v989_v59 = vmul.f32 0.0625, %v977_v14  ;;  %v1003_v3 = vmul.f32 %v1859_v58, %v1859_v58 }
 0x30a   : > { %v1862_v0 = vsub.f32 %v1660_v44, %v989_v59 }
 0x30b   : > { %v983_v20 = vpop.xlane.xlu0 %982 }
 0x30c   : > { %2270 = vst [vmem:[#allocation7_spill] sm:$0xff] %v1862_v0  ;;  %v991_v2 = vmul.f32 0.0625, %v983_v20  ;;  %v1005_v7 = vmul.f32 %v1862_v0, %v1862_v0  ;;  %v974_v9 = vpop.xlane.xlu1 %973 }
 0x30d   : > { %v988_v47 = vmul.f32 0.0625, %v974_v9 }
 0x30e   : > { %v1868_v30 = vsub.f32 %v1679_v56, %v991_v2 }
 0x30f   : > { %v568_v54 = vpop.permute.xlu0 %567  ;;  %v1881_v14 = vsub.f32 %v1672_v53, %v988_v47 }
 0x310   : > { %v592_v21 = vsel %vm343_vm1, %v568_v54, 0.0  ;;  %2271 = vst [vmem:[#allocation8_spill] sm:$0xff] %v1868_v30  ;;  %v1007_v13 = vmul.f32 %v1868_v30, %v1868_v30  ;;  %v1002_v54 = vmul.f32 %v1878_v36, %v1878_v36  ;;  %v422_v36 = vmul.f32 0.0625, %v1847_v28 }
 0x311   : > { %2273 = vst [vmem:[#allocation10_spill] sm:$0xff] %v1881_v14  ;;  %v1004_v2 = vmul.f32 %v1881_v14, %v1881_v14 }
 0x313   : > { %v570_v50 = vpop.permute.xlu0 %569 }
 0x325   : > { %593 = vadd.xlane.f32.xlu0 %v592_v21  ;;  %v576_v21 = vpop.permute.xlu0 %575 }
 0x329   : > { %v574_v9 = vpop.permute.xlu0 %573 }
 0x33b   : > { %1022 = vrot.lane.b32.xlu0 %v1003_v3, %s1482_s20  ;;  %v1894_v3 = vsub.f32 %v1642_v33, %v832_v57 }
 0x33d   : > { %v848_v33 = vmul.f32 %v1894_v3, %v1894_v3 }
 0x33f   : > { %1026 = vrot.lane.b32.xlu0 %v1005_v7, %s1482_s20  ;;  %v595_v7 = vsel %vm343_vm1, %v570_v50, 0.0  ;;  %v856_v31 = vsel %vm343_vm1, %v848_v33, 0.0  ;;  %v604_v33 = vsel %vm343_vm1, %v576_v21, 0.0 }
 0x343   : > { %1030 = vrot.lane.b32.xlu0 %v1007_v13, %s1482_s20  ;;  %v836_v13 = vmul.f32 0.0625, %v1767_v11 }
 0x345   : > { %v980_v17 = vpop.xlane.xlu1 %979  ;;  %v1909_v8 = vsub.f32 %v1672_v53, %v836_v13 }
 0x346   : > { %v990_v20 = vmul.f32 0.0625, %v980_v17  ;;  %v1903_v17 = vsub.f32 %v1658_v43, %v834_v4 }
 0x347   : > { %v852_v50 = vmul.f32 %v1909_v8, %v1909_v8 }
 0x348   : > { %v1888_v59 = vsub.f32 %v1731_v42, %v990_v20  ;;  %v850_v47 = vmul.f32 %v1903_v17, %v1903_v17  ;;  %v580_v20 = vpop.permute.xlu0 %579 }
 0x349   : > { %v566_v37 = vpop.permute.xlu1 %565  ;;  %v868_v53 = vsel %vm343_vm1, %v852_v50, 0.0 }
 0x34a   : > { %v589_v18 = vsel %vm343_vm1, %v566_v37, 0.0  ;;  %2274 = vst [vmem:[#allocation11_spill] sm:$0xff] %v1888_v59  ;;  %v1006_v39 = vmul.f32 %v1888_v59, %v1888_v59  ;;  %v601_v37 = vsel %vm343_vm1, %v574_v9, 0.0  ;;  %v862_v43 = vsel %vm343_vm1, %v850_v47, 0.0 }
 0x34b   : > { %590 = vadd.xlane.f32.xlu1 %v589_v18  ;;  %v838_v18 = vmul.f32 0.0625, %v828_v19  ;;  %v833_v9 = vmul.f32 0.0625, %v1711_v23  ;;  %v610_v47 = vsel %vm343_vm1, %v580_v20, 0.0  ;;  %v420_v59 = vmul.f32 0.0625, %v1845_v26 }
 0x34d   : > { %v1915_v11 = vsub.f32 %v1731_v42, %v838_v18  ;;  %v1929_v13 = vsub.f32 %v1640_v32, %v833_v9  ;;  %v839_v32 = vmul.f32 0.0625, %v1807_v48  ;;  %v1964_v9 = vld [vmem:[%s2257_s3] ss:$0 sm:$0xff] }
 0x34f   : > { %v854_v19 = vmul.f32 %v1915_v11, %v1915_v11  ;;  %v849_v23 = vmul.f32 %v1929_v13, %v1929_v13 }
 0x351   : > { %v874_v57 = vsel %vm343_vm1, %v854_v19, 0.0 }
 0x35c   : > { %1020 = vrot.lane.b32.xlu1 %v1002_v54, %s1482_s20  ;;  %v572_v54 = vpop.permute.xlu1 %571 }
 0x360   : > { %1024 = vrot.lane.b32.xlu1 %v1004_v2, %s1482_s20  ;;  %v578_v2 = vpop.permute.xlu0 %577  ;;  %v1017_v4 = vpop.permute.xlu1 %1016 }
 0x361   : > { %v607_v42 = vsel %vm343_vm1, %v578_v2, 0.0 }
 0x362   : > { %596 = vadd.xlane.f32.xlu0 %v595_v7  ;;  %v1040_v7 = vsel %vm343_vm1, %v1017_v4, 0.0 }
 0x364   : > { %1028 = vrot.lane.b32.xlu1 %v1006_v39, %s1482_s20  ;;  %v598_v39 = vsel %vm343_vm1, %v572_v54, 0.0  ;;  %s1425_s20 = scalar_lea.vmem %s1424_s14, 4096 }
 0x365   : > { %p1427_p1 = scmp.lt.s32.totalorder %s1425_s20, %s1419_s12 }
 0x366   : > { %602 = vadd.xlane.f32.xlu0 %v601_v37  ;;  %v835_v37 = vmul.f32 0.0625, %v1729_v41  ;;  %v859_v41 = vsel %vm343_vm1, %v849_v23, 0.0 }
 0x367   : > { %p1428_p2 = por %p1427_p1, %p1426_p0 }
 0x368   : > { %v1934_v18 = vsub.f32 %v1646_v34, %v835_v37  ;;  %v1948_v34 = vsub.f32 %v1679_v56, %v839_v32 }
 0x369   : > { %p1429_p3 = pnand %p1428_p2, %p1422_p13 }
 0x36a   : > { %857 = vadd.xlane.f32.xlu0 %v856_v31  ;;  %v837_v31 = vmul.f32 0.0625, %v1770_v22  ;;  %v851_v21 = vmul.f32 %v1934_v18, %v1934_v18  ;;  %v855_v48 = vmul.f32 %v1948_v34, %v1948_v34 }
 0x36c   : > { %v865_v22 = vsel %vm343_vm1, %v851_v21, 0.0  ;;  %v877_v20 = vsel %vm343_vm1, %v855_v48, 0.0 }
 0x36e   : > { %863 = vadd.xlane.f32.xlu0 %v862_v43  ;;  %v1941_v43 = vsub.f32 %v1660_v44, %v837_v31 }
 0x370   : > { %v853_v50 = vmul.f32 %v1941_v43, %v1941_v43 }
 0x372   : > { %869 = vadd.xlane.f32.xlu0 %v868_v53  ;;  %v871_v44 = vsel %vm343_vm1, %v853_v50, 0.0 }
 0x376   : > { %875 = vadd.xlane.f32.xlu0 %v874_v57 }
 0x378   : > { %v1019_v53 = vpop.permute.xlu0 %1018 }
 0x379   : > { %v1043_v19 = vsel %vm343_vm1, %v1019_v53, 0.0 }
 0x37a   : > { %608 = vadd.xlane.f32.xlu0 %v607_v42 }
 0x37e   : > { %1041 = vadd.xlane.f32.xlu0 %v1040_v7 }
 0x388   : > { %599 = vadd.xlane.f32.xlu1 %v598_v39 }
 0x38c   : > { %605 = vadd.xlane.f32.xlu1 %v604_v33 }
 0x390   : > { %611 = vadd.xlane.f32.xlu1 %v610_v47 }
 0x394   : > { %860 = vadd.xlane.f32.xlu1 %v859_v41  ;;  %v1973_v41 = vld [vmem:[%s2256_s2] ss:$0 sm:$0xff] }
 0x398   : > { %866 = vadd.xlane.f32.xlu1 %v865_v22 }
 0x39c   : > { %872 = vadd.xlane.f32.xlu1 %v871_v44 }
 0x3a0   : > { %878 = vadd.xlane.f32.xlu1 %v877_v20 }
 0x3a4   : > { %1044 = vadd.xlane.f32.xlu1 %v1043_v19 }
 0x3ae   : > { %v594_v56 = vpop.xlane.xlu0 %593 }
 0x3b2   : > { %v1023_v54 = vpop.permute.xlu0 %1022 }
 0x3b3   : > { %v1049_v57 = vsel %vm343_vm1, %v1023_v54, 0.0 }
 0x3b4   : > { %1050 = vadd.xlane.f32.xlu1 %v1049_v57 }
 0x3b6   : > { %v1027_v2 = vpop.permute.xlu0 %1026 }
 0x3b7   : > { %v1055_v42 = vsel %vm343_vm1, %v1027_v2, 0.0 }
 0x3b8   : > { %1056 = vadd.xlane.f32.xlu1 %v1055_v42  ;;  %v417_v42 = vmul.f32 0.0625, %v1800_v55  ;;  %v424_v55 = vmul.f32 0.0625, %v1849_v29 }
 0x3ba   : > { %v1031_v4 = vpop.permute.xlu0 %1030 }
 0x3bb   : > { %v1061_v7 = vsel %vm343_vm1, %v1031_v4, 0.0  ;;  %v419_v4 = vmul.f32 0.0625, %v1805_v25 }
 0x3bc   : > { %1062 = vadd.xlane.f32.xlu1 %v1061_v7  ;;  %v421_v7 = vmul.f32 0.0625, %v1818_v27  ;;  %v614_v27 = vmul.f32 0.0625, %v594_v56 }
 0x3be   : > { %v429_v14 = vadd.f32 1e-05, %v421_v7  ;;  %v622_v7 = vadd.f32 1e-05, %v614_v27 }
 0x3cd   : > { %656 = vrot.lane.b32.xlu1 %v1964_v9, %s1483_s27 }
 0x3d4   : > { %v591_v39 = vpop.xlane.xlu1 %590 }
 0x3d5   : > { %v613_v58 = vmul.f32 0.0625, %v591_v39 }
 0x3d8   : > { %v1021_v37 = vpop.permute.xlu1 %1020 }
 0x3d9   : > { %v1046_v33 = vsel %vm343_vm1, %v1021_v37, 0.0 }
 0x3da   : > { %1047 = vadd.xlane.f32.xlu0 %v1046_v33  ;;  %v423_v33 = vmul.f32 0.0625, %v1821_v61  ;;  %v428_v61 = vadd.f32 1e-05, %v420_v59 }
 0x3dc   : > { %v1025_v31 = vpop.permute.xlu1 %1024  ;;  %v431_v30 = vadd.f32 1e-05, %v423_v33  ;;  %v621_v33 = vadd.f32 1e-05, %v613_v58 }
 0x3dd   : > { %v1052_v47 = vsel %vm343_vm1, %v1025_v31, 0.0 }
 0x3de   : > { %1053 = vadd.xlane.f32.xlu0 %v1052_v47  ;;  %v425_v47 = vadd.f32 1e-05, %v417_v42  ;;  %v430_v42 = vadd.f32 1e-05, %v422_v36 }
 0x3e0   : > { %v1029_v23 = vpop.permute.xlu1 %1028  ;;  %1355 = vrsqrt.f32 %v425_v47 }
 0x3e1   : > { %v1058_v32 = vsel %vm343_vm1, %v1029_v23, 0.0  ;;  %v418_v23 = vmul.f32 0.0625, %v1843_v40 }
 0x3e2   : > { %1059 = vadd.xlane.f32.xlu0 %v1058_v32  ;;  %v427_v32 = vadd.f32 1e-05, %v419_v4  ;;  %v432_v4 = vadd.f32 1e-05, %v424_v55 }
 0x3e3   : > { %v426_v25 = vadd.f32 1e-05, %v418_v23 }
 0x3e4   : > { %1357 = vrsqrt.f32 %v427_v32 }
 0x3e5   : > { %1359 = vrsqrt.f32 %v429_v14 }
 0x3e6   : > { %1361 = vrsqrt.f32 %v431_v30 }
 0x3e7   : > { %1363 = vrsqrt.f32 %v426_v25 }
 0x3e8   : > { %1365 = vrsqrt.f32 %v428_v61 }
 0x3e9   : > { %1367 = vrsqrt.f32 %v430_v42 }
 0x3ea   : > { %1369 = vrsqrt.f32 %v432_v4 }
 0x3eb   : > { %v597_v22 = vpop.xlane.xlu0 %596  ;;  %1371 = vrsqrt.f32 %v622_v7 }
 0x3ec   : > { %v615_v40 = vmul.f32 0.0625, %v597_v22  ;;  %1373 = vrsqrt.f32 %v621_v33 }
 0x3ed   : > { %v1356_v27 = vpop.eup %1355 }
 0x3ee   : > { %v623_v56 = vadd.f32 1e-05, %v615_v40 }
 0x3ef   : > { %v603_v44 = vpop.xlane.xlu0 %602 }
 0x3f0   : > { %v617_v26 = vmul.f32 0.0625, %v603_v44  ;;  %1375 = vrsqrt.f32 %v623_v56 }
 0x3f2   : > { %v625_v59 = vadd.f32 1e-05, %v617_v26 }
 0x3f3   : > { %v858_v20 = vpop.xlane.xlu0 %857 }
 0x3f4   : > { %v880_v28 = vmul.f32 0.0625, %v858_v20  ;;  %1377 = vrsqrt.f32 %v625_v59 }
 0x3f6   : > { %v888_v36 = vadd.f32 1e-05, %v880_v28 }
 0x3f7   : > { %v864_v19 = vpop.xlane.xlu0 %863 }
 0x3f8   : > { %645 = vrot.lane.b32.xlu0 %v1973_v41, %s1483_s27  ;;  %v882_v29 = vmul.f32 0.0625, %v864_v19  ;;  %1379 = vrsqrt.f32 %v888_v36 }
 0x3fa   : > { %v890_v30 = vadd.f32 1e-05, %v882_v29 }
 0x3fb   : > { %v870_v57 = vpop.xlane.xlu0 %869 }
 0x3fc   : > { %v884_v23 = vmul.f32 0.0625, %v870_v57  ;;  %1381 = vrsqrt.f32 %v890_v30 }
 0x3fe   : > { %v892_v44 = vadd.f32 1e-05, %v884_v23 }
 0x3ff   : > { %v876_v37 = vpop.xlane.xlu0 %875 }
 0x400   : > { %v886_v39 = vmul.f32 0.0625, %v876_v37  ;;  %1383 = vrsqrt.f32 %v892_v44 }
 0x402   : > { %v894_v58 = vadd.f32 1e-05, %v886_v39 }
 0x403   : > { %v609_v0 = vpop.xlane.xlu0 %608 }
 0x404   : > { %v619_v14 = vmul.f32 0.0625, %v609_v0  ;;  %v1358_v0 = vpop.eup %1357  ;;  %1385 = vrsqrt.f32 %v894_v58 }
 0x405   : > { %v1360_v4 = vpop.eup %1359 }
 0x406   : > { %v627_v25 = vadd.f32 1e-05, %v619_v14  ;;  %v1362_v26 = vpop.eup %1361 }
 0x407   : > { %v1042_v32 = vpop.xlane.xlu0 %1041  ;;  %v1364_v28 = vpop.eup %1363 }
 0x408   : > { %v1064_v22 = vmul.f32 0.0625, %v1042_v32  ;;  %1387 = vrsqrt.f32 %v627_v25  ;;  %v1366_v56 = vpop.eup %1365 }
 0x40a   : > { %v1072_v37 = vadd.f32 1e-05, %v1064_v22 }
 0x40c   : > { %1389 = vrsqrt.f32 %v1072_v37  ;;  %v445_v37 = vmul.f32 %v1360_v4, %v1698_v10 }
 0x411   : > { %v1976_v21 = vpop.xlane.xlu1 %599 }
 0x412   : > { %v616_v57 = vmul.f32 0.0625, %v1976_v21 }
 0x414   : > { %v624_v7 = vadd.f32 1e-05, %v616_v57  ;;  %v443_v57 = vmul.f32 %v1358_v0, %v1692_v5 }
 0x415   : > { %v1978_v50 = vpop.xlane.xlu1 %605 }
 0x416   : > { %v618_v61 = vmul.f32 0.0625, %v1978_v50  ;;  %v457_v10 = vmul.f32 %v1973_v41, %v443_v57 }
 0x418   : > { %v626_v33 = vadd.f32 1e-05, %v618_v61  ;;  %v447_v61 = vmul.f32 %v1362_v26, %v1706_v15  ;;  %v459_v15 = vmul.f32 %v1973_v41, %v445_v37 }
 0x419   : > { %v1980_v48 = vpop.xlane.xlu1 %611 }
 0x41a   : > { %v620_v21 = vmul.f32 0.0625, %v1980_v48  ;;  %v461_v4 = vmul.f32 %v1973_v41, %v447_v61 }
 0x41d   : > { %v861_v53 = vpop.xlane.xlu1 %860 }
 0x41e   : > { %v881_v20 = vmul.f32 0.0625, %v861_v53 }
 0x420   : > { %v889_v42 = vadd.f32 1e-05, %v881_v20 }
 0x421   : > { %v867_v54 = vpop.xlane.xlu1 %866 }
 0x422   : > { %v883_v19 = vmul.f32 0.0625, %v867_v54  ;;  %1391 = vrsqrt.f32 %v889_v42 }
 0x424   : > { %v891_v53 = vadd.f32 1e-05, %v883_v19 }
 0x425   : > { %v1982_v2 = vpop.xlane.xlu1 %872 }
 0x426   : > { %v885_v40 = vmul.f32 0.0625, %v1982_v2  ;;  %v1368_v2 = vpop.eup %1367  ;;  %1393 = vrsqrt.f32 %v891_v53  ;;  %v444_v53 = vmul.f32 %v1366_v56, %v1742_v52 }
 0x427   : > { %v1370_v36 = vpop.eup %1369  ;;  %1395 = vrsqrt.f32 %v624_v7  ;;  %v446_v7 = vmul.f32 %v1368_v2, %v1749_v38  ;;  %v2027_v2 = vadd.f32 %v1964_v9, %v457_v10 }
 0x428   : > { %v893_v23 = vadd.f32 1e-05, %v885_v40  ;;  %v1999_v30 = vpop.eup %1371  ;;  %1397 = vrsqrt.f32 %v626_v33  ;;  %v442_v40 = vmul.f32 %v1364_v28, %v1738_v49  ;;  %v448_v5 = vmul.f32 %v1370_v36, %v1755_v63 }
 0x429   : > { %v1988_v31 = vpop.xlane.xlu1 %878  ;;  %v2001_v22 = vpop.eup %1373  ;;  %v458_v26 = vmul.f32 %v1973_v41, %v444_v53  ;;  %v460_v38 = vmul.f32 %v1973_v41, %v446_v7  ;;  %v638_v37 = vmul.f32 %v1999_v30, %v1777_v35 }
 0x42a   : > { %v887_v54 = vmul.f32 0.0625, %v1988_v31  ;;  %v628_v31 = vadd.f32 1e-05, %v620_v21  ;;  %1399 = vrsqrt.f32 %v893_v23  ;;  %v2003_v44 = vpop.eup %1375  ;;  %v456_v52 = vmul.f32 %v1973_v41, %v442_v40 }
 0x42b   : > { %v1378_v20 = vpop.eup %1377  ;;  %v462_v56 = vmul.f32 %v1973_v41, %v448_v5  ;;  %v637_v40 = vmul.f32 %v2001_v22, %v1825_v6  ;;  %v639_v53 = vmul.f32 %v2003_v44, %v1780_v45 }
 0x42c   : > { %v895_v59 = vadd.f32 1e-05, %v887_v54  ;;  %v1380_v19 = vpop.eup %1379  ;;  %v2037_v36 = vadd.f32 %v1964_v9, %v456_v52  ;;  %v641_v7 = vmul.f32 %v1378_v20, %v1792_v16 }
 0x42d   : > { %v1045_v46 = vpop.xlane.xlu1 %1044  ;;  %v1382_v25 = vpop.eup %1381  ;;  %v904_v28 = vmul.f32 %v1380_v19, %v1894_v3  ;;  %v2050_v57 = vadd.f32 %v1964_v9, %v462_v56 }
 0x42e   : > { %v1065_v29 = vmul.f32 0.0625, %v1045_v46  ;;  %1401 = vrsqrt.f32 %v895_v59  ;;  %v1384_v42 = vpop.eup %1383  ;;  %v906_v33 = vmul.f32 %v1382_v25, %v1903_v17  ;;  %v2030_v59 = vadd.f32 %v1964_v9, %v459_v15 }
 0x42f   : > { %1403 = vrsqrt.f32 %v628_v31  ;;  %v1386_v54 = vpop.eup %1385  ;;  %v2040_v31 = vadd.f32 %v1964_v9, %v458_v26 }
 0x430   : > { %v1073_v48 = vadd.f32 1e-05, %v1065_v29  ;;  %v914_v19 = vmul.f32 %v1973_v41, %v906_v33  ;;  %v2073_v16 = vmul.f32 %v1386_v54, %v1915_v11 }
 0x432   : > { %1405 = vrsqrt.f32 %v1073_v48  ;;  %v2067_v6 = vadd.f32 %v1964_v9, %v914_v19 }
 0x43d   : > { %v1051_v47 = vpop.xlane.xlu1 %1050 }
 0x43e   : > { %v1067_v32 = vmul.f32 0.0625, %v1051_v47 }
 0x440   : > { %v1075_v46 = vadd.f32 1e-05, %v1067_v32 }
 0x441   : > { %v1057_v55 = vpop.xlane.xlu1 %1056 }
 0x442   : > { %v1069_v39 = vmul.f32 0.0625, %v1057_v55  ;;  %v441_v55 = vmul.f32 %v1356_v27, %v1689_v1  ;;  %1407 = vrsqrt.f32 %v1075_v46  ;;  %v1388_v1 = vpop.eup %1387 }
 0x443   : > { %v1390_v0 = vpop.eup %1389 }
 0x444   : > { %v1077_v47 = vadd.f32 1e-05, %v1069_v39  ;;  %v455_v27 = vmul.f32 %v1973_v41, %v441_v55  ;;  %v1392_v49 = vpop.eup %1391  ;;  %v2033_v39 = vadd.f32 %v1964_v9, %v461_v4 }
 0x445   : > { %v1063_v50 = vpop.xlane.xlu1 %1062  ;;  %v1394_v21 = vpop.eup %1393  ;;  %v905_v3 = vmul.f32 %v1392_v49, %v1929_v13  ;;  %v908_v13 = vmul.f32 %v1384_v42, %v1909_v8 }
 0x446   : > { %v1071_v14 = vmul.f32 0.0625, %v1063_v50  ;;  %1409 = vrsqrt.f32 %v1077_v47  ;;  %v1396_v29 = vpop.eup %1395  ;;  %v2023_v50 = vadd.f32 %v1964_v9, %v455_v27  ;;  %v2044_v47 = vadd.f32 %v1964_v9, %v460_v38 }
 0x447   : > { %v1398_v32 = vpop.eup %1397  ;;  %v913_v8 = vmul.f32 %v1973_v41, %v905_v3  ;;  %v2070_v45 = vmul.f32 %v1973_v41, %v908_v13  ;;  %v640_v4 = vmul.f32 %v1396_v29, %v1829_v12  ;;  %v2276_v12 = vld [vmem:[#allocation6_spill] sm:$0xff] }
 0x448   : > { %v1079_v58 = vadd.f32 1e-05, %v1071_v14  ;;  %v1400_v17 = vpop.eup %1399  ;;  %v907_v14 = vmul.f32 %v1394_v21, %v1934_v18  ;;  %v642_v49 = vmul.f32 %v1398_v32, %v1786_v51  ;;  %v2277_v51 = vld [vmem:[#allocation7_spill] sm:$0xff] }
 0x449   : > { %v1402_v46 = vpop.eup %1401  ;;  %v909_v5 = vmul.f32 %v1400_v17, %v1941_v43  ;;  %v643_v43 = vmul.f32 %v1388_v1, %v1810_v62  ;;  %v2081_v26 = vadd.f32 %v1964_v9, %v913_v8  ;;  %v2275_v1 = vld [vmem:[#allocation5_spill] sm:$0xff] }
 0x44a   : > { %1411 = vrsqrt.f32 %v1079_v58  ;;  %v912_v58 = vmul.f32 %v1973_v41, %v904_v28  ;;  %v1404_v25 = vpop.eup %1403  ;;  %v915_v27 = vmul.f32 %v1973_v41, %v907_v14  ;;  %v911_v35 = vmul.f32 %v1402_v46, %v1948_v34 }
 0x44b   : > { %v1406_v61 = vpop.eup %1405  ;;  %v1088_v34 = vmul.f32 %v1390_v0, %v1835_v24  ;;  %v644_v52 = vmul.f32 %v1404_v25, %v1803_v60  ;;  %v917_v62 = vmul.f32 %v1973_v41, %v909_v5  ;;  %v2278_v60 = vld [vmem:[#allocation8_spill] sm:$0xff] }
 0x44c   : > { %v2064_v15 = vadd.f32 %v1964_v9, %v912_v58  ;;  %v2085_v11 = vadd.f32 %v1964_v9, %v915_v27  ;;  %v919_v24 = vmul.f32 %v1973_v41, %v911_v35  ;;  %v1089_v0 = vmul.f32 %v1406_v61, %v2275_v1  ;;  %v2279_v35 = vld [vmem:[#allocation9_spill] sm:$0xff] }
 0x44f   : > { %v1408_v42 = vpop.eup %1407 }
 0x450   : > { %v1091_v21 = vmul.f32 %v1408_v42, %v2276_v12 }
 0x453   : > { %v1410_v10 = vpop.eup %1409 }
 0x454   : > { %v1093_v38 = vmul.f32 %v1410_v10, %v2277_v51  ;;  %v918_v51 = vmul.f32 %v1973_v41, %v2073_v16 }
 0x457   : > { %v1412_v44 = vpop.eup %1411 }
 0x458   : > { %v1095_v28 = vmul.f32 %v1412_v44, %v2278_v60 }
 0x463   : > { %v1048_v63 = vpop.xlane.xlu0 %1047 }
 0x464   : > { %v1066_v23 = vmul.f32 0.0625, %v1048_v63 }
 0x466   : > { %v1074_v48 = vadd.f32 1e-05, %v1066_v23  ;;  %v2098_v23 = vpop.permute.xlu1 %656 }
 0x467   : > { %v1054_v55 = vpop.xlane.xlu0 %1053 }
 0x468   : > { %1413 = vrsqrt.f32 %v1074_v48  ;;  %v1068_v18 = vmul.f32 0.0625, %v1054_v55 }
 0x46a   : > { %v1076_v30 = vadd.f32 1e-05, %v1068_v18 }
 0x46b   : > { %v1060_v22 = vpop.xlane.xlu0 %1059 }
 0x46c   : > { %1415 = vrsqrt.f32 %v1076_v30  ;;  %v1070_v20 = vmul.f32 0.0625, %v1060_v22 }
 0x46e   : > { %v1078_v54 = vadd.f32 1e-05, %v1070_v20  ;;  %v927_v20 = vadd.f32 %v1964_v9, %v919_v24 }
 0x46f   : > { %v2093_v33 = vpop.permute.xlu0 %645 }
 0x470   : > { %1417 = vrsqrt.f32 %v1078_v54  ;;  %v648_v63 = vmul.f32 %v2093_v33, %v637_v40  ;;  %v649_v29 = vmul.f32 %v2093_v33, %v638_v37  ;;  %v650_v56 = vmul.f32 %v2093_v33, %v639_v53 }
 0x471   : > { %v651_v32 = vmul.f32 %v2093_v33, %v640_v4  ;;  %v652_v3 = vmul.f32 %v2093_v33, %v641_v7  ;;  %v653_v17 = vmul.f32 %v2093_v33, %v642_v49  ;;  %v654_v14 = vmul.f32 %v2093_v33, %v643_v43 }
 0x472   : > { %v655_v48 = vmul.f32 %v2093_v33, %v644_v52  ;;  %v1096_v46 = vmul.f32 %v1088_v34, %v2093_v33  ;;  %v1097_v58 = vmul.f32 %v1089_v0, %v2093_v33  ;;  %v1099_v19 = vmul.f32 %v1091_v21, %v2093_v33  ;;  %v2280_v52 = vld [vmem:[#allocation10_spill] sm:$0xff] }
 0x473   : > { %v1101_v13 = vmul.f32 %v1093_v38, %v2093_v33  ;;  %v1103_v55 = vmul.f32 %v1095_v28, %v2093_v33  ;;  %v659_v25 = vadd.f32 %v2098_v23, %v648_v63  ;;  %v660_v37 = vadd.f32 %v2098_v23, %v649_v29  ;;  %v2281_v38 = vld [vmem:[#allocation11_spill] sm:$0xff] }
 0x474   : > { %v661_v18 = vadd.f32 %v2098_v23, %v650_v56  ;;  %v662_v61 = vadd.f32 %v2098_v23, %v651_v32  ;;  %v663_v40 = vadd.f32 %v2098_v23, %v652_v3  ;;  %v664_v53 = vadd.f32 %v2098_v23, %v653_v17 }
 0x475   : > { %v1414_v7 = vpop.eup %1413  ;;  %v665_v8 = vadd.f32 %v2098_v23, %v654_v14  ;;  %v666_v42 = vadd.f32 %v2098_v23, %v655_v48  ;;  %v667_v27 = vsel %vm343_vm1, %v2023_v50, %v659_v25  ;;  %v668_v5 = vsel %vm343_vm1, %v2037_v36, %v660_v37 }
 0x476   : > { %v1090_v30 = vmul.f32 %v1414_v7, %v2279_v35  ;;  %v669_v10 = vsel %vm343_vm1, %v2027_v2, %v661_v18  ;;  %v670_v22 = vsel %vm343_vm1, %v2040_v31, %v662_v61  ;;  %v671_v44 = vsel %vm343_vm1, %v2030_v59, %v663_v40  ;;  %675 = vst.msk [vmem:[%s2131_s6] sm:$0xff] %vm213_vm0, %v667_v27 }
 0x477   : > { %676 = vst.msk [vmem:[%s2131_s6 + $0x10] sm:$0xff] %vm213_vm0, %v668_v5  ;;  %v672_v50 = vsel %vm343_vm1, %v2044_v47, %v664_v53  ;;  %v673_v2 = vsel %vm343_vm1, %v2033_v39, %v665_v8  ;;  %v674_v59 = vsel %vm343_vm1, %v2050_v57, %v666_v42  ;;  %677 = vst.msk [vmem:[%s2131_s6 + $0x20] sm:$0xff] %vm213_vm0, %v669_v10 }
 0x478   : > { %678 = vst.msk [vmem:[%s2131_s6 + $0x30] sm:$0xff] %vm213_vm0, %v670_v22  ;;  %679 = vst.msk [vmem:[%s2131_s6 + $0x40] sm:$0xff] %vm213_vm0, %v671_v44  ;;  %v1104_v36 = vadd.f32 %v1096_v46, %v2098_v23  ;;  %v1098_v31 = vmul.f32 %v1090_v30, %v2093_v33  ;;  %v1105_v39 = vadd.f32 %v1097_v58, %v2098_v23 }
 0x479   : > { %680 = vst.msk [vmem:[%s2131_s6 + $0x50] sm:$0xff] %vm213_vm0, %v672_v50  ;;  %681 = vst.msk [vmem:[%s2131_s6 + $0x60] sm:$0xff] %vm213_vm0, %v673_v2  ;;  %v1107_v47 = vadd.f32 %v1099_v19, %v2098_v23  ;;  %v1109_v57 = vadd.f32 %v1101_v13, %v2098_v23  ;;  %v1416_v43 = vpop.eup %1415  ;;  %v925_v34 = vadd.f32 %v1964_v9, %v917_v62 }
 0x47a   : > { %682 = vst.msk [vmem:[%s2131_s6 + $0x70] sm:$0xff] %vm213_vm0, %v674_v59  ;;  %v1111_v4 = vadd.f32 %v1103_v55, %v2098_v23  ;;  %v1112_v49 = vsel %vm343_vm1, %v2064_v15, %v1104_v36  ;;  %v1092_v54 = vmul.f32 %v1416_v43, %v2280_v52  ;;  %v1106_v1 = vadd.f32 %v1098_v31, %v2098_v23 }
 0x47b   : > { %v1113_v0 = vsel %vm343_vm1, %v2081_v26, %v1105_v39  ;;  %v1115_v12 = vsel %vm343_vm1, %v2085_v11, %v1107_v47  ;;  %1231 = vst.msk [vmem:[%s2131_s6 + $0x8] sm:$0xff] %vm213_vm0, %v1112_v49  ;;  %v1117_v62 = vsel %vm343_vm1, %v925_v34, %v1109_v57  ;;  %v924_v21 = vadd.f32 %v1964_v9, %v2070_v45 }
 0x47c   : > { %v1119_v24 = vsel %vm343_vm1, %v927_v20, %v1111_v4  ;;  %1232 = vst.msk [vmem:[%s2131_s6 + $0x18] sm:$0xff] %vm213_vm0, %v1113_v0  ;;  %1234 = vst.msk [vmem:[%s2131_s6 + $0x38] sm:$0xff] %vm213_vm0, %v1115_v12  ;;  %v1100_v15 = vmul.f32 %v1092_v54, %v2093_v33  ;;  %v1114_v26 = vsel %vm343_vm1, %v2067_v6, %v1106_v1 }
 0x47d   : > { %1236 = vst.msk [vmem:[%s2131_s6 + $0x58] sm:$0xff] %vm213_vm0, %v1117_v62  ;;  %1238 = vst.msk [vmem:[%s2131_s6 + $0x78] sm:$0xff] %vm213_vm0, %v1119_v24  ;;  %v1418_v11 = vpop.eup %1417  ;;  %v926_v29 = vadd.f32 %v1964_v9, %v918_v51 }
 0x47e   : > { %1233 = vst.msk [vmem:[%s2131_s6 + $0x28] sm:$0xff] %vm213_vm0, %v1114_v26  ;;  %v1094_v60 = vmul.f32 %v1418_v11, %v2281_v38  ;;  %v1108_v6 = vadd.f32 %v1100_v15, %v2098_v23 }
 0x480   : > { %v1102_v28 = vmul.f32 %v1094_v60, %v2093_v33  ;;  %v1116_v63 = vsel %vm343_vm1, %v924_v21, %v1108_v6 }
 0x481   : > { %1235 = vst.msk [vmem:[%s2131_s6 + $0x48] sm:$0xff] %vm213_vm0, %v1116_v63 }
 0x482   : > { %v1110_v45 = vadd.f32 %v1102_v28, %v2098_v23 }
 0x484   : > { %v1118_v41 = vsel %vm343_vm1, %v926_v29, %v1110_v45 }
 0x485   : > { %1237 = vst.msk [vmem:[%s2131_s6 + $0x68] sm:$0xff] %vm213_vm0, %v1118_v41 }
 0x486   : > { %1432 = shalt.err (!%p1429_p3)
}
 0x487   : > { %s1433_s22 = scalar_lea.hbm %s2205_s11, 2048  ;;  %s1437_s28 = scalar_lea.hbm %s2258_s4, 4096 }
 0x488   : > { %p1434_p4 = scmp.ne.s32.totalorder %s2205_s11, %s1433_s22  ;;  %p1438_p9 = scmp.lt.s32.totalorder %s2205_s11, %s2258_s4 }
 0x489   : > { %p1439_p10 = scmp.lt.s32.totalorder %s1437_s28, %s1433_s22 }
 0x48a   : > { %p1435_p7 = pnand %p1434_p4, %p1550_p5 }
 0x48b   : > { %p1440_p11 = por %p1439_p10, %p1438_p9 }
 0x48c   : > { %p1436_p8 = pneg %p1435_p7 }
 0x48e   : > { %p1441_p12 = pnand %p1440_p11, %p1436_p8 }
 0x490   : > { %1444 = shalt.err (!%p1441_p12)
}
 0x491   : > { %s1485_s5 = smov 128   ;;  %s1486_s6 = smov 8  }
 0x492   : > { %1311 = dma.vmem_to_hbm [thread:$0]  (%p1550_p5), %s2207_s8, 2048, %s2205_s11, %s2214_s19, %s1485_s5, %s1485_s5, %s1486_s6  }
 0x493 PF: > { %p1317_p13 = scmp.ge.s32.totalorder %s1479_s18, 2  ;;  %s1159_s7 = sand.u32 1, %s1467_s15  }
 0x494   : > { %s1160_s9 = scalar_lea.sflag [#allocation3], %s1159_s7 }
 0x495   : > { %p1314_p0 = pnand %p1317_p13, %p1554_p6 }
 0x497   : > { %p1315_p1 = pneg %p1314_p0 }
 0x499   : > { %1462 = dma.done.wait (%p1315_p1), %s1160_s9, 2048  }
 0x49a   : > { %1464 = vsyncadd (%p1315_p1), %s1160_s9, 4294965248  ;;  %p14_p2 = scmp.ge.s32.totalorder %s1537_s21, 4   ;;  %s2282_s15 = smov %s1471_s16 }
 0x49b   : > { %s2283_s16 = smov %s1475_s17  ;;  %s2284_s17 = smov %s1548_s24 }
 0x49c   : > { %s2285_s18 = smov %s1537_s21  ;;  %16 = sbr.rel (!%p14_p2) target bundleno = 3 (0x3), region = 72 }
 0x4a1   :  { %1165 = vsyncpa [#allocation3], 1 }
 0x4a2   :  { %1167 = vsyncpa [#allocation3 + $0x1], 1 }

// kernel: tpu_custom_call.1
= control target key start
LH: loop header
LB: loop body
LE: loop exit
PB: predicated region body
PF: predicated region fallthrough
CT: control target
= control target key end

     0   :  { %9 = vsyncpa [#allocation3], 0  ;;  %s2254_s0 = inlined_call_operand.vmem [shape: f32[128,32], index: 0, kind: input, shape index: {}]   ;;  %s2255_s1 = inlined_call_operand.vmem [shape: f32[32,64], index: 1, kind: input, shape index: {}]   ;;  %s2256_s2 = inlined_call_operand.vmem [shape: f32[1,16], index: 2, kind: input, shape index: {}]   ;;  %s2257_s3 = inlined_call_operand.vmem [shape: f32[1,16], index: 3, kind: input, shape index: {}]   ;;  %s2258_s4 = inlined_call_operand.hbm [shape: f32[16,2,8,32], index: 4, kind: output, shape index: {}]  }
   0x1   :  { %11 = vsyncpa [#allocation3 + $0x1], 0  ;;  %s1512_s15 = smov 0   ;;  %s1514_s16 = smov 0  }
   0x2   :  { %s1516_s17 = smov 0   ;;  %s1518_s18 = smov 0  }
   0x3 LB: > { %s1533_s19 = sadd.s32 4294967295, %s1479_s18   ;;  %s1206_s20 = sadd.s32 4294967294, %s1479_s18   ;;  %s1479_s18 = sphi %s1518_s18, %s2285_s18   ;;  %s1475_s17 = sphi %s1516_s17, %s2284_s17   ;;  %s1471_s16 = sphi %s1514_s16, %s2283_s16   ;;  %s1467_s15 = sphi %s1512_s15, %s2282_s15  }
   0x4   : > { %s1537_s21 = sadd.s32 1, %s1479_s18   ;;  %s113_s22 = sadd.s32 1, %s1475_s17 }
   0x5   : > { %s110_s23 = ssub.s32 %s1479_s18, %s1537_s21  ;;  %p123_p0 = scmp.ne.s32.totalorder %s1475_s17, %s1471_s16 }
   0x6   : > { %p111_p1 = scmp.eq.s32.totalorder %s110_s23, 0  ;;  %p124_p2 = scmp.eq.s32.totalorder %s1533_s19, 1 }
   0x7   : > { %p129_p3 = scmp.ne.s32.totalorder %s1471_s16, %s1467_s15  ;;  %p130_p4 = scmp.eq.s32.totalorder %s1206_s20, 1 }
   0x8   : > { %s1548_s24 = scalar_select %p111_p1, %s1475_s17, %s113_s22  }
   0x9   : > { %p1550_p5 = por %p124_p2, %p123_p0  ;;  %p1554_p6 = por %p130_p4, %p129_p3 }
   0xa   : > { %p1209_p7 = scmp.ge.s32.totalorder %s1479_s18, 1  ;;  %p166_p8 = scmp.lt.s32.totalorder %s1479_s18, 3 }
   0xc   : > { %p167_p9 = pnand %p1209_p7, %p166_p8 }
   0xe   : > { %170 = sbr.rel (%p167_p9) target bundleno = 1171 (0x493), region = 36 }
  0x13   : > { %v212_v0 = vld [vmem:[%s2255_s1 + $0x18] sm:$0xff]  ;;  %v211_v1 = vld [vmem:[%s2255_s1 + $0x10] sm:$0xff]  ;;  %s1211_s5 = sshll.u32 %s1533_s19, 3  ;;  %v210_v2 = vld [vmem:[%s2255_s1 + $0x8] sm:$0xff]  ;;  %s1481_s8 = smov 96   ;;  %vm213_vm0 = vcmask 261120  }
  0x14   : > { %1271 = vmatprep.subr.mxu0 %v212_v0  ;;  %p193_p10 = scmp.lt.s32.totalorder %s1211_s5, 15  ;;  %697 = vrot.lane.b32.xlu0 %v212_v0, %s1481_s8  ;;  %v209_v3 = vld [vmem:[%s2255_s1] sm:$0xff]  ;;  %vm343_vm1 = vcmask 130048   ;;  %s1482_s20 = smov 112  }
  0x15   : > { %1272 = vmatpush3.msra.mxu0 %v212_v0  ;;  %693 = vrot.lane.b32.xlu1 %v210_v2, %s1481_s8  ;;  %s1483_s27 = smov 16   ;;  %s189_s30 = sand.u32 1, %s1471_s16  }
  0x16   : > { %1273 = vmatprep.subr.mxu0 %v211_v1  ;;  %s2287_s5 = smov (!%p193_p10, %s1211_s5), 15  ;;  %s1246_s7 = sshll.u32 %s1533_s19, 11 }
  0x17   : > { %1274 = vmatpush3.msra.mxu0 %v211_v1  ;;  %s1212_s11 = sshll.u32 %s2287_s5, 3  ;;  %s1210_s5 = sshll.u32 %s189_s30, 7 }
  0x18   : > { %1275 = vmatprep.subr.mxu0 %v210_v2  ;;  %695 = vrot.lane.b32.xlu0 %v211_v1, %s1481_s8  ;;  %s196_s14 = scalar_lea.vmem %s2254_s0, %s1212_s11  ;;  %s2131_s6 = scalar_lea.vmem [#allocation2], %s1210_s5 }
  0x19   : > { %1276 = vmatpush3.msra.mxu0 %v210_v2  ;;  %691 = vrot.lane.b32.xlu1 %v209_v3, %s1481_s8  ;;  %v199_v4 = vld [vmem:[%s196_s14] sm:$0xff]  ;;  %v200_v5 = vld [vmem:[%s196_s14 + $0x8] sm:$0xff]  ;;  %v201_v6 = vld [vmem:[%s196_s14 + $0x10] sm:$0xff]  ;;  %s1144_s8 = sshll.u32 %s2131_s6, 4  ;;  %s2205_s11 = scalar_lea.hbm %s2258_s4, %s1246_s7  ;;  %s2207_s8 = int_to_ptr.vmem [resolvable:$true] %s1144_s8 }
  0x1a   : > { %1277 = vmatprep.subr.mxu0 %v209_v3  ;;  %1279 = vmatprep.mubr.msk.f32.mxu0 %vm213_vm0, %v199_v4  ;;  %v202_v7 = vld [vmem:[%s196_s14 + $0x18] sm:$0xff]  ;;  %v203_v8 = vld [vmem:[%s196_s14 + $0x20] sm:$0xff]  ;;  %v204_v9 = vld [vmem:[%s196_s14 + $0x28] sm:$0xff]  ;;  %s2214_s19 = scalar_lea.sflag [#allocation3], %s189_s30  ;;  %s1419_s12 = scalar_lea.vmem %s2207_s8, 2048 }
  0x1b   : > { %1278 = vmatpush3.msra.mxu0 %v209_v3  ;;  %1299 = vmatprep.mubr.msk.f32.mxu1 %vm213_vm0, %v199_v4  ;;  %v205_v10 = vld [vmem:[%s196_s14 + $0x30] sm:$0xff]  ;;  %v206_v11 = vld [vmem:[%s196_s14 + $0x38] sm:$0xff]  ;;  %p1420_p11 = scmp.ne.s32.totalorder %s2207_s8, %s1419_s12  ;;  %s1484_s13 = smov [#allocation2]  }
  0x1c   : > { %1280 = vmatmul.mubr.msk.f32.vlgmr.msra.gmra.mxu0 %vm213_vm0, %v200_v5  ;;  %s1423_s14 = sshll.u32 %s1484_s13, 4  ;;  %s1424_s14 = int_to_ptr.vmem [resolvable:$false] %s1423_s14 }
  0x1d   : > { %1282 = vmatprep.mubr.msk.f32.mxu0 %vm213_vm0, %v201_v6  ;;  %p1421_p12 = pnand %p1420_p11, %p1550_p5  ;;  %p1426_p0 = scmp.lt.s32.totalorder %s2207_s8, %s1424_s14 }
  0x1f   : > { %p1422_p13 = pneg %p1421_p12 }
  0x20   : > { %1283 = vmatmul.mubr.msk.f32.gmra.mxu0 %vm213_vm0, %v202_v7 }
  0x21   : > { %1285 = vmatprep.mubr.msk.f32.mxu0 %vm213_vm0, %v203_v8 }
  0x24   : > { %1286 = vmatmul.mubr.msk.f32.gmra.mxu0 %vm213_vm0, %v204_v9 }
  0x25   : > { %1288 = vmatprep.mubr.msk.f32.mxu0 %vm213_vm0, %v205_v10 }
  0x28   : > { %1289 = vmatmul.mubr.msk.f32.gmra.mxu0 %vm213_vm0, %v206_v11 }
  0x86   : > { %v698_v12 = vpop.permute.xlu0 %697 }
  0x87   : > { %1291 = vmatprep.subr.mxu1 %v698_v12  ;;  %v694_v13 = vpop.permute.xlu1 %693 }
  0x88   : > { %1292 = vmatpush3.msra.mxu1 %v698_v12 }
  0x8a   : > { %v696_v14 = vpop.permute.xlu0 %695 }
  0x8b   : > { %1293 = vmatprep.subr.mxu1 %v696_v14  ;;  %v692_v15 = vpop.permute.xlu1 %691 }
  0x8c   : > { %1294 = vmatpush3.msra.mxu1 %v696_v14 }
  0x8d   : > { %1295 = vmatprep.subr.mxu1 %v694_v13 }
  0x8e   : > { %1296 = vmatpush3.msra.mxu1 %v694_v13 }
  0x8f   : > { %1297 = vmatprep.subr.mxu1 %v692_v15 }
  0x90   : > { %1298 = vmatpush3.msra.mxu1 %v692_v15 }
  0x91   : > { %1300 = vmatmul.mubr.msk.f32.vlgmr.msra.gmra.mxu1 %vm213_vm0, %v200_v5 }
  0x92   : > { %1302 = vmatprep.mubr.msk.f32.mxu1 %vm213_vm0, %v201_v6 }
  0x95   : > { %1303 = vmatmul.mubr.msk.f32.gmra.mxu1 %vm213_vm0, %v202_v7 }
  0x96   : > { %1305 = vmatprep.mubr.msk.f32.mxu1 %vm213_vm0, %v203_v8 }
  0x99   : > { %1306 = vmatmul.mubr.msk.f32.gmra.mxu1 %vm213_vm0, %v204_v9 }
  0x9a   : > { %1308 = vmatprep.mubr.msk.f32.mxu1 %vm213_vm0, %v205_v10 }
  0x9d   : > { %1309 = vmatmul.mubr.msk.f32.gmra.mxu1 %vm213_vm0, %v206_v11 }
  0xdc   : > { %v1592_v16 = vpop.f32.mrf.mxu0 }
  0xdd   : > { %487 = vrot.lane.b32.xlu0 %v1592_v16, %s1482_s20  ;;  %v347_v17 = vsel %vm343_vm1, %v1592_v16, 0.0 }
  0xde   : > { %348 = vadd.xlane.f32.xlu1 %v347_v17  ;;  %v1598_v18 = vpop.f32.mrf.mxu0 }
  0xdf   : > { %v344_v22 = vsel %vm343_vm1, %v1598_v18, 0.0 }
  0xe0   : > { %v1602_v19 = vpop.f32.mrf.mxu0 }
  0xe1   : > { %v353_v23 = vsel %vm343_vm1, %v1602_v19, 0.0 }
  0xe2   : > { %v1606_v20 = vpop.f32.mrf.mxu0 }
  0xe3   : > { %v350_v24 = vsel %vm343_vm1, %v1606_v20, 0.0 }
  0xe4   : > { %v1610_v21 = vpop.f32.mrf.mxu0 }
  0xe5   : > { %v359_v26 = vsel %vm343_vm1, %v1610_v21, 0.0 }
  0xe6   : > { %v1620_v25 = vpop.f32.mrf.mxu0 }
  0xe7   : > { %v356_v28 = vsel %vm343_vm1, %v1620_v25, 0.0 }
  0xe8   : > { %v1626_v27 = vpop.f32.mrf.mxu0 }
  0xe9   : > { %v365_v29 = vsel %vm343_vm1, %v1626_v27, 0.0 }
  0xea   : > { %v1634_v30 = vpop.f32.mrf.mxu0 }
  0xeb   : > { %v362_v31 = vsel %vm343_vm1, %v1634_v30, 0.0 }
  0xef   : > { %485 = vrot.lane.b32.xlu1 %v1598_v18, %s1482_s20 }
  0xf3   : > { %491 = vrot.lane.b32.xlu1 %v1602_v19, %s1482_s20 }
  0xf7   : > { %489 = vrot.lane.b32.xlu1 %v1606_v20, %s1482_s20 }
  0xfb   : > { %495 = vrot.lane.b32.xlu1 %v1610_v21, %s1482_s20 }
  0xfc   : > { %345 = vadd.xlane.f32.xlu0 %v344_v22 }
 0x100   : > { %354 = vadd.xlane.f32.xlu0 %v353_v23 }
 0x104   : > { %351 = vadd.xlane.f32.xlu0 %v350_v24 }
 0x11a   : > { %493 = vrot.lane.b32.xlu0 %v1620_v25, %s1482_s20 }
 0x11f   : > { %360 = vadd.xlane.f32.xlu1 %v359_v26 }
 0x130   : > { %499 = vrot.lane.b32.xlu1 %v1626_v27, %s1482_s20 }
 0x139   : > { %357 = vadd.xlane.f32.xlu0 %v356_v28 }
 0x13d   : > { %366 = vadd.xlane.f32.xlu0 %v365_v29 }
 0x14f   : > { %v488_v35 = vpop.permute.xlu0 %487 }
 0x150   : > { %v512_v36 = vsel %vm343_vm1, %v488_v35, 0.0 }
 0x151   : > { %v1640_v32 = vpop.f32.mrf.mxu1 }
 0x152   : > { %v811_v37 = vsel %vm343_vm1, %v1640_v32, 0.0 }
 0x153   : > { %497 = vrot.lane.b32.xlu0 %v1634_v30, %s1482_s20  ;;  %v1642_v33 = vpop.f32.mrf.mxu1 }
 0x154   : > { %363 = vadd.xlane.f32.xlu1 %v362_v31  ;;  %v808_v47 = vsel %vm343_vm1, %v1642_v33, 0.0 }
 0x155   : > { %v1646_v34 = vpop.f32.mrf.mxu1 }
 0x156   : > { %v817_v50 = vsel %vm343_vm1, %v1646_v34, 0.0 }
 0x157   : > { %v1658_v43 = vpop.f32.mrf.mxu1 }
 0x158   : > { %v814_v58 = vsel %vm343_vm1, %v1658_v43, 0.0 }
 0x159   : > { %v1660_v44 = vpop.f32.mrf.mxu1 }
 0x15a   : > { %v823_v62 = vsel %vm343_vm1, %v1660_v44, 0.0 }
 0x15b   : > { %v1672_v53 = vpop.f32.mrf.mxu1 }
 0x15c   : > { %v820_v55 = vsel %vm343_vm1, %v1672_v53, 0.0 }
 0x15d   : > { %v1679_v56 = vpop.f32.mrf.mxu1 }
 0x165   : > { %938 = vrot.lane.b32.xlu1 %v1640_v32, %s1482_s20 }
 0x167   : > { %v1653_v38 = vpop.xlane.xlu1 %348 }
 0x169   : > { %942 = vrot.lane.b32.xlu1 %v1646_v34, %s1482_s20 }
 0x16b   : > { %v486_v39 = vpop.permute.xlu1 %485 }
 0x16c   : > { %v509_v45 = vsel %vm343_vm1, %v486_v39, 0.0 }
 0x16f   : > { %v492_v40 = vpop.permute.xlu1 %491 }
 0x170   : > { %v518_v49 = vsel %vm343_vm1, %v492_v40, 0.0 }
 0x172   : > { %513 = vadd.xlane.f32.xlu0 %v512_v36  ;;  %v829_v36 = vsel %vm343_vm1, %v1679_v56, 0.0 }
 0x173   : > { %v490_v41 = vpop.permute.xlu1 %489 }
 0x174   : > { %v515_v42 = vsel %vm343_vm1, %v490_v41, 0.0 }
 0x176   : > { %812 = vadd.xlane.f32.xlu0 %v811_v37 }
 0x177   : > { %v496_v59 = vpop.permute.xlu1 %495 }
 0x178   : > { %v524_v60 = vsel %vm343_vm1, %v496_v59, 0.0 }
 0x185   : > { %v346_v46 = vpop.xlane.xlu0 %345 }
 0x186   : > { %v369_v63 = vmul.f32 0.0625, %v346_v46 }
 0x188   : > { %v1689_v1 = vsub.f32 %v1598_v18, %v369_v63 }
 0x189   : > { %v1667_v48 = vpop.xlane.xlu0 %354 }
 0x18a   : > { %v385_v8 = vmul.f32 %v1689_v1, %v1689_v1 }
 0x18c   : > { %936 = vrot.lane.b32.xlu0 %v1642_v33, %s1482_s20  ;;  %v393_v12 = vsel %vm343_vm1, %v385_v8, 0.0 }
 0x18d   : > { %516 = vadd.xlane.f32.xlu1 %v515_v42  ;;  %v352_v51 = vpop.xlane.xlu0 %351  ;;  %v1731_v42 = vpop.f32.mrf.mxu1 }
 0x18e   : > { %v371_v2 = vmul.f32 0.0625, %v352_v51 }
 0x190   : > { %v1692_v5 = vsub.f32 %v1606_v20, %v371_v2 }
 0x191   : > { %v494_v52 = vpop.permute.xlu0 %493 }
 0x192   : > { %v521_v54 = vsel %vm343_vm1, %v494_v52, 0.0  ;;  %v387_v13 = vmul.f32 %v1692_v5, %v1692_v5 }
 0x194   : > { %v399_v17 = vsel %vm343_vm1, %v387_v13, 0.0 }
 0x19e   : > { %946 = vrot.lane.b32.xlu1 %v1660_v44, %s1482_s20 }
 0x1a8   : > { %v361_v0 = vpop.xlane.xlu1 %360 }
 0x1ab   : > { %510 = vadd.xlane.f32.xlu0 %v509_v45 }
 0x1ac   : > { %v500_v3 = vpop.permute.xlu1 %499 }
 0x1ad   : > { %v530_v35 = vsel %vm343_vm1, %v500_v3, 0.0 }
 0x1af   : > { %809 = vadd.xlane.f32.xlu0 %v808_v47  ;;  %v370_v47 = vmul.f32 0.0625, %v1653_v38 }
 0x1b3   : > { %519 = vadd.xlane.f32.xlu0 %v518_v49  ;;  %v1738_v49 = vsub.f32 %v1592_v16, %v370_v47 }
 0x1b7   : > { %818 = vadd.xlane.f32.xlu0 %v817_v50  ;;  %v372_v50 = vmul.f32 0.0625, %v1667_v48 }
 0x1b9   : > { %v1742_v52 = vsub.f32 %v1602_v19, %v372_v50 }
 0x1bb   : > { %v388_v48 = vmul.f32 %v1742_v52, %v1742_v52 }
 0x1c2   : > { %522 = vadd.xlane.f32.xlu1 %v521_v54  ;;  %v358_v57 = vpop.xlane.xlu0 %357  ;;  %v374_v54 = vmul.f32 0.0625, %v361_v0  ;;  %v402_v0 = vsel %vm343_vm1, %v388_v48, 0.0 }
 0x1c3   : > { %v373_v6 = vmul.f32 0.0625, %v358_v57  ;;  %v386_v57 = vmul.f32 %v1738_v49, %v1738_v49 }
 0x1c4   : > { %v1749_v38 = vsub.f32 %v1610_v21, %v374_v54 }
 0x1c5   : > { %v1698_v10 = vsub.f32 %v1620_v25, %v373_v6 }
 0x1c6   : > { %821 = vadd.xlane.f32.xlu1 %v820_v55  ;;  %v367_v61 = vpop.xlane.xlu0 %366  ;;  %v826_v55 = vsel %vm343_vm1, %v1731_v42, 0.0  ;;  %v390_v2 = vmul.f32 %v1749_v38, %v1749_v38 }
 0x1c7   : > { %v389_v22 = vmul.f32 %v1698_v10, %v1698_v10  ;;  %v376_v59 = vmul.f32 0.0625, %v367_v61 }
 0x1c9   : > { %v405_v24 = vsel %vm343_vm1, %v389_v22, 0.0  ;;  %v1755_v63 = vsub.f32 %v1626_v27, %v376_v59 }
 0x1ca   : > { %v498_v4 = vpop.permute.xlu0 %497 }
 0x1cb   : > { %v527_v7 = vsel %vm343_vm1, %v498_v4, 0.0  ;;  %v408_v4 = vsel %vm343_vm1, %v390_v2, 0.0  ;;  %v392_v61 = vmul.f32 %v1755_v63, %v1755_v63 }
 0x1cd   : > { %940 = vrot.lane.b32.xlu0 %v1658_v43, %s1482_s20  ;;  %v414_v6 = vsel %vm343_vm1, %v392_v61, 0.0 }
 0x1d7   : > { %950 = vrot.lane.b32.xlu1 %v1679_v56, %s1482_s20 }
 0x1dd   : > { %v364_v9 = vpop.xlane.xlu1 %363 }
 0x1de   : > { %v375_v11 = vmul.f32 0.0625, %v364_v9 }
 0x1e0   : > { %v1706_v15 = vsub.f32 %v1634_v30, %v375_v11 }
 0x1e1   : > { %v939_v51 = vpop.permute.xlu1 %938 }
 0x1e2   : > { %v391_v26 = vmul.f32 %v1706_v15, %v1706_v15  ;;  %v963_v9 = vsel %vm343_vm1, %v939_v51, 0.0 }
 0x1e4   : > { %v411_v28 = vsel %vm343_vm1, %v391_v26, 0.0 }
 0x1ec   : > { %815 = vadd.xlane.f32.xlu0 %v814_v58  ;;  %v943_v58 = vpop.permute.xlu1 %942 }
 0x1ed   : > { %v969_v13 = vsel %vm343_vm1, %v943_v58, 0.0 }
 0x1f0   : > { %525 = vadd.xlane.f32.xlu0 %v524_v60  ;;  %v396_v60 = vsel %vm343_vm1, %v386_v57, 0.0 }
 0x1f4   : > { %824 = vadd.xlane.f32.xlu0 %v823_v62 }
 0x1fb   : > { %528 = vadd.xlane.f32.xlu1 %v527_v7  ;;  %v1703_v14 = vpop.xlane.xlu0 %513 }
 0x1ff   : > { %394 = vadd.xlane.f32.xlu1 %v393_v12  ;;  %v1711_v23 = vpop.xlane.xlu0 %812 }
 0x203   : > { %400 = vadd.xlane.f32.xlu1 %v399_v17  ;;  %v937_v29 = vpop.permute.xlu0 %936 }
 0x204   : > { %v960_v31 = vsel %vm343_vm1, %v937_v29, 0.0 }
 0x207   : > { %406 = vadd.xlane.f32.xlu1 %v405_v24 }
 0x20a   : > { %944 = vrot.lane.b32.xlu0 %v1672_v53, %s1482_s20 }
 0x20b   : > { %412 = vadd.xlane.f32.xlu1 %v411_v28 }
 0x20f   : > { %961 = vadd.xlane.f32.xlu1 %v960_v31  ;;  %v534_v31 = vmul.f32 0.0625, %v1703_v14 }
 0x216   : > { %v517_v62 = vpop.xlane.xlu1 %516 }
 0x21a   : > { %v947_v3 = vpop.permute.xlu1 %946 }
 0x21b   : > { %v975_v24 = vsel %vm343_vm1, %v947_v3, 0.0 }
 0x229   : > { %531 = vadd.xlane.f32.xlu0 %v530_v35  ;;  %v1777_v35 = vsub.f32 %v1592_v16, %v534_v31 }
 0x22b   : > { %v550_v47 = vmul.f32 %v1777_v35, %v1777_v35 }
 0x22d   : > { %830 = vadd.xlane.f32.xlu0 %v829_v36  ;;  %v535_v36 = vmul.f32 0.0625, %v517_v62 }
 0x234   : > { %v1723_v37 = vpop.xlane.xlu0 %510 }
 0x238   : > { %v1725_v39 = vpop.xlane.xlu0 %809 }
 0x23c   : > { %v1727_v40 = vpop.xlane.xlu0 %519 }
 0x240   : > { %v1729_v41 = vpop.xlane.xlu0 %818 }
 0x243   : > { %948 = vrot.lane.b32.xlu0 %v1731_v42, %s1482_s20 }
 0x244   : > { %v941_v45 = vpop.permute.xlu0 %940 }
 0x245   : > { %v966_v46 = vsel %vm343_vm1, %v941_v45, 0.0  ;;  %v1780_v45 = vsub.f32 %v1606_v20, %v535_v36 }
 0x246   : > { %967 = vadd.xlane.f32.xlu1 %v966_v46 }
 0x247   : > { %v551_v14 = vmul.f32 %v1780_v45, %v1780_v45 }
 0x24b   : > { %v523_v7 = vpop.xlane.xlu1 %522 }
 0x24c   : > { %v537_v50 = vmul.f32 0.0625, %v523_v7  ;;  %v536_v7 = vmul.f32 0.0625, %v1727_v40 }
 0x24e   : > { %v1792_v16 = vsub.f32 %v1620_v25, %v537_v50 }
 0x24f   : > { %v1767_v11 = vpop.xlane.xlu1 %821 }
 0x250   : > { %v553_v54 = vmul.f32 %v1792_v16, %v1792_v16 }
 0x253   : > { %v951_v17 = vpop.permute.xlu1 %950 }
 0x254   : > { %v981_v26 = vsel %vm343_vm1, %v951_v17, 0.0 }
 0x262   : > { %827 = vadd.xlane.f32.xlu0 %v826_v55 }
 0x266   : > { %397 = vadd.xlane.f32.xlu0 %v396_v60 }
 0x26a   : > { %403 = vadd.xlane.f32.xlu0 %v402_v0 }
 0x26e   : > { %409 = vadd.xlane.f32.xlu0 %v408_v4 }
 0x272   : > { %415 = vadd.xlane.f32.xlu0 %v414_v6 }
 0x275   : > { %v1764_v8 = vpop.xlane.xlu0 %815 }
 0x276   : > { %964 = vadd.xlane.f32.xlu0 %v963_v9 }
 0x279   : > { %v526_v12 = vpop.xlane.xlu0 %525 }
 0x27a   : > { %970 = vadd.xlane.f32.xlu0 %v969_v13  ;;  %v538_v46 = vmul.f32 0.0625, %v526_v12  ;;  %v1829_v12 = vsub.f32 %v1602_v19, %v536_v7 }
 0x27c   : > { %v1786_v51 = vsub.f32 %v1610_v21, %v538_v46 }
 0x27d   : > { %v1770_v22 = vpop.xlane.xlu0 %824 }
 0x27e   : > { %976 = vadd.xlane.f32.xlu0 %v975_v24  ;;  %v554_v20 = vmul.f32 %v1786_v51, %v1786_v51 }
 0x281   : > { %v945_v28 = vpop.permute.xlu0 %944 }
 0x282   : > { %982 = vadd.xlane.f32.xlu0 %v981_v26  ;;  %v972_v29 = vsel %vm343_vm1, %v945_v28, 0.0 }
 0x283   : > { %973 = vadd.xlane.f32.xlu1 %v972_v29 }
 0x284   : > { %v529_v21 = vpop.xlane.xlu1 %528 }
 0x285   : > { %v539_v58 = vmul.f32 0.0625, %v529_v21 }
 0x287   : > { %v1810_v62 = vsub.f32 %v1634_v30, %v539_v58  ;;  %v533_v30 = vmul.f32 0.0625, %v1723_v37  ;;  %v552_v37 = vmul.f32 %v1829_v12, %v1829_v12 }
 0x288   : > { %v1800_v55 = vpop.xlane.xlu1 %394 }
 0x289   : > { %v555_v4 = vmul.f32 %v1810_v62, %v1810_v62  ;;  %v1825_v6 = vsub.f32 %v1598_v18, %v533_v30 }
 0x28b   : > { %v549_v17 = vmul.f32 %v1825_v6, %v1825_v6 }
 0x28c   : > { %v1805_v25 = vpop.xlane.xlu1 %400 }
 0x298   : > { %567 = vrot.lane.b32.xlu0 %v550_v47, %s1482_s20 }
 0x29c   : > { %569 = vrot.lane.b32.xlu0 %v551_v14, %s1482_s20 }
 0x2a0   : > { %575 = vrot.lane.b32.xlu0 %v554_v20, %s1482_s20 }
 0x2a4   : > { %573 = vrot.lane.b32.xlu0 %v553_v54, %s1482_s20 }
 0x2b2   : > { %v532_v57 = vpop.xlane.xlu0 %531 }
 0x2b3   : > { %v540_v59 = vmul.f32 0.0625, %v532_v57 }
 0x2b5   : > { %v1803_v60 = vsub.f32 %v1626_v27, %v540_v59  ;;  %v1818_v27 = vpop.xlane.xlu1 %406 }
 0x2b6   : > { %v1807_v48 = vpop.xlane.xlu0 %830 }
 0x2b7   : > { %v556_v0 = vmul.f32 %v1803_v60, %v1803_v60 }
 0x2b9   : > { %579 = vrot.lane.b32.xlu0 %v556_v0, %s1482_s20  ;;  %v1821_v61 = vpop.xlane.xlu1 %412 }
 0x2ba   : > { %v949_v2 = vpop.permute.xlu0 %948 }
 0x2bb   : > { %v978_v3 = vsel %vm343_vm1, %v949_v2, 0.0 }
 0x2bc   : > { %979 = vadd.xlane.f32.xlu1 %v978_v3 }
 0x2bd   : > { %577 = vrot.lane.b32.xlu0 %v555_v4, %s1482_s20  ;;  %v962_v9 = vpop.xlane.xlu1 %961 }
 0x2be   : > { %v984_v13 = vmul.f32 0.0625, %v962_v9 }
 0x2c0   : > { %v1835_v24 = vsub.f32 %v1642_v33, %v984_v13 }
 0x2c2   : > { %v1000_v18 = vmul.f32 %v1835_v24, %v1835_v24 }
 0x2cd   : > { %565 = vrot.lane.b32.xlu1 %v549_v17, %s1482_s20 }
 0x2cf   : > { %v968_v4 = vpop.xlane.xlu1 %967 }
 0x2d1   : > { %571 = vrot.lane.b32.xlu1 %v552_v37, %s1482_s20 }
 0x2d5   : > { %1016 = vrot.lane.b32.xlu1 %v1000_v18, %s1482_s20 }
 0x2eb   : > { %v828_v19 = vpop.xlane.xlu0 %827 }
 0x2ef   : > { %v1843_v40 = vpop.xlane.xlu0 %397 }
 0x2f3   : > { %v1845_v26 = vpop.xlane.xlu0 %403 }
 0x2f7   : > { %v1847_v28 = vpop.xlane.xlu0 %409 }
 0x2fb   : > { %v1849_v29 = vpop.xlane.xlu0 %415 }
 0x2ff   : > { %v965_v31 = vpop.xlane.xlu0 %964 }
 0x300   : > { %v985_v36 = vmul.f32 0.0625, %v965_v31  ;;  %v986_v31 = vmul.f32 0.0625, %v968_v4  ;;  %v834_v4 = vmul.f32 0.0625, %v1764_v8 }
 0x302   : > { %v1852_v46 = vsub.f32 %v1640_v32, %v985_v36  ;;  %v1878_v36 = vsub.f32 %v1658_v43, %v986_v31 }
 0x303   : > { %v971_v50 = vpop.xlane.xlu0 %970 }
 0x304   : > { %2268 = vst [vmem:[#allocation5_spill] sm:$0xff] %v1852_v46  ;;  %v1001_v47 = vmul.f32 %v1852_v46, %v1852_v46  ;;  %v987_v57 = vmul.f32 0.0625, %v971_v50  ;;  %2272 = vst [vmem:[#allocation9_spill] sm:$0xff] %v1878_v36 }
 0x306   : > { %1018 = vrot.lane.b32.xlu0 %v1001_v47, %s1482_s20  ;;  %v1859_v58 = vsub.f32 %v1646_v34, %v987_v57  ;;  %v832_v57 = vmul.f32 0.0625, %v1725_v39 }
 0x307   : > { %v977_v14 = vpop.xlane.xlu0 %976 }
 0x308   : > { %2269 = vst [vmem:[#allocation6_spill] sm:$0xff] %v1859_v58  ;;  %v989_v59 = vmul.f32 0.0625, %v977_v14  ;;  %v1003_v3 = vmul.f32 %v1859_v58, %v1859_v58 }
 0x30a   : > { %v1862_v0 = vsub.f32 %v1660_v44, %v989_v59 }
 0x30b   : > { %v983_v20 = vpop.xlane.xlu0 %982 }
 0x30c   : > { %2270 = vst [vmem:[#allocation7_spill] sm:$0xff] %v1862_v0  ;;  %v991_v2 = vmul.f32 0.0625, %v983_v20  ;;  %v1005_v7 = vmul.f32 %v1862_v0, %v1862_v0  ;;  %v974_v9 = vpop.xlane.xlu1 %973 }
 0x30d   : > { %v988_v47 = vmul.f32 0.0625, %v974_v9 }
 0x30e   : > { %v1868_v30 = vsub.f32 %v1679_v56, %v991_v2 }
 0x30f   : > { %v568_v54 = vpop.permute.xlu0 %567  ;;  %v1881_v14 = vsub.f32 %v1672_v53, %v988_v47 }
 0x310   : > { %v592_v21 = vsel %vm343_vm1, %v568_v54, 0.0  ;;  %2271 = vst [vmem:[#allocation8_spill] sm:$0xff] %v1868_v30  ;;  %v1007_v13 = vmul.f32 %v1868_v30, %v1868_v30  ;;  %v1002_v54 = vmul.f32 %v1878_v36, %v1878_v36  ;;  %v422_v36 = vmul.f32 0.0625, %v1847_v28 }
 0x311   : > { %2273 = vst [vmem:[#allocation10_spill] sm:$0xff] %v1881_v14  ;;  %v1004_v2 = vmul.f32 %v1881_v14, %v1881_v14 }
 0x313   : > { %v570_v50 = vpop.permute.xlu0 %569 }
 0x325   : > { %593 = vadd.xlane.f32.xlu0 %v592_v21  ;;  %v576_v21 = vpop.permute.xlu0 %575 }
 0x329   : > { %v574_v9 = vpop.permute.xlu0 %573 }
 0x33b   : > { %1022 = vrot.lane.b32.xlu0 %v1003_v3, %s1482_s20  ;;  %v1894_v3 = vsub.f32 %v1642_v33, %v832_v57 }
 0x33d   : > { %v848_v33 = vmul.f32 %v1894_v3, %v1894_v3 }
 0x33f   : > { %1026 = vrot.lane.b32.xlu0 %v1005_v7, %s1482_s20  ;;  %v595_v7 = vsel %vm343_vm1, %v570_v50, 0.0  ;;  %v856_v31 = vsel %vm343_vm1, %v848_v33, 0.0  ;;  %v604_v33 = vsel %vm343_vm1, %v576_v21, 0.0 }
 0x343   : > { %1030 = vrot.lane.b32.xlu0 %v1007_v13, %s1482_s20  ;;  %v836_v13 = vmul.f32 0.0625, %v1767_v11 }
 0x345   : > { %v980_v17 = vpop.xlane.xlu1 %979  ;;  %v1909_v8 = vsub.f32 %v1672_v53, %v836_v13 }
 0x346   : > { %v990_v20 = vmul.f32 0.0625, %v980_v17  ;;  %v1903_v17 = vsub.f32 %v1658_v43, %v834_v4 }
 0x347   : > { %v852_v50 = vmul.f32 %v1909_v8, %v1909_v8 }
 0x348   : > { %v1888_v59 = vsub.f32 %v1731_v42, %v990_v20  ;;  %v850_v47 = vmul.f32 %v1903_v17, %v1903_v17  ;;  %v580_v20 = vpop.permute.xlu0 %579 }
 0x349   : > { %v566_v37 = vpop.permute.xlu1 %565  ;;  %v868_v53 = vsel %vm343_vm1, %v852_v50, 0.0 }
 0x34a   : > { %v589_v18 = vsel %vm343_vm1, %v566_v37, 0.0  ;;  %2274 = vst [vmem:[#allocation11_spill] sm:$0xff] %v1888_v59  ;;  %v1006_v39 = vmul.f32 %v1888_v59, %v1888_v59  ;;  %v601_v37 = vsel %vm343_vm1, %v574_v9, 0.0  ;;  %v862_v43 = vsel %vm343_vm1, %v850_v47, 0.0 }
 0x34b   : > { %590 = vadd.xlane.f32.xlu1 %v589_v18  ;;  %v838_v18 = vmul.f32 0.0625, %v828_v19  ;;  %v833_v9 = vmul.f32 0.0625, %v1711_v23  ;;  %v610_v47 = vsel %vm343_vm1, %v580_v20, 0.0  ;;  %v420_v59 = vmul.f32 0.0625, %v1845_v26 }
 0x34d   : > { %v1915_v11 = vsub.f32 %v1731_v42, %v838_v18  ;;  %v1929_v13 = vsub.f32 %v1640_v32, %v833_v9  ;;  %v839_v32 = vmul.f32 0.0625, %v1807_v48  ;;  %v1964_v9 = vld [vmem:[%s2257_s3] ss:$0 sm:$0xff] }
 0x34f   : > { %v854_v19 = vmul.f32 %v1915_v11, %v1915_v11  ;;  %v849_v23 = vmul.f32 %v1929_v13, %v1929_v13 }
 0x351   : > { %v874_v57 = vsel %vm343_vm1, %v854_v19, 0.0 }
 0x35c   : > { %1020 = vrot.lane.b32.xlu1 %v1002_v54, %s1482_s20  ;;  %v572_v54 = vpop.permute.xlu1 %571 }
 0x360   : > { %1024 = vrot.lane.b32.xlu1 %v1004_v2, %s1482_s20  ;;  %v578_v2 = vpop.permute.xlu0 %577  ;;  %v1017_v4 = vpop.permute.xlu1 %1016 }
 0x361   : > { %v607_v42 = vsel %vm343_vm1, %v578_v2, 0.0 }
 0x362   : > { %596 = vadd.xlane.f32.xlu0 %v595_v7  ;;  %v1040_v7 = vsel %vm343_vm1, %v1017_v4, 0.0 }
 0x364   : > { %1028 = vrot.lane.b32.xlu1 %v1006_v39, %s1482_s20  ;;  %v598_v39 = vsel %vm343_vm1, %v572_v54, 0.0  ;;  %s1425_s20 = scalar_lea.vmem %s1424_s14, 4096 }
 0x365   : > { %p1427_p1 = scmp.lt.s32.totalorder %s1425_s20, %s1419_s12 }
 0x366   : > { %602 = vadd.xlane.f32.xlu0 %v601_v37  ;;  %v835_v37 = vmul.f32 0.0625, %v1729_v41  ;;  %v859_v41 = vsel %vm343_vm1, %v849_v23, 0.0 }
 0x367   : > { %p1428_p2 = por %p1427_p1, %p1426_p0 }
 0x368   : > { %v1934_v18 = vsub.f32 %v1646_v34, %v835_v37  ;;  %v1948_v34 = vsub.f32 %v1679_v56, %v839_v32 }
 0x369   : > { %p1429_p3 = pnand %p1428_p2, %p1422_p13 }
 0x36a   : > { %857 = vadd.xlane.f32.xlu0 %v856_v31  ;;  %v837_v31 = vmul.f32 0.0625, %v1770_v22  ;;  %v851_v21 = vmul.f32 %v1934_v18, %v1934_v18  ;;  %v855_v48 = vmul.f32 %v1948_v34, %v1948_v34 }
 0x36c   : > { %v865_v22 = vsel %vm343_vm1, %v851_v21, 0.0  ;;  %v877_v20 = vsel %vm343_vm1, %v855_v48, 0.0 }
 0x36e   : > { %863 = vadd.xlane.f32.xlu0 %v862_v43  ;;  %v1941_v43 = vsub.f32 %v1660_v44, %v837_v31 }
 0x370   : > { %v853_v50 = vmul.f32 %v1941_v43, %v1941_v43 }
 0x372   : > { %869 = vadd.xlane.f32.xlu0 %v868_v53  ;;  %v871_v44 = vsel %vm343_vm1, %v853_v50, 0.0 }
 0x376   : > { %875 = vadd.xlane.f32.xlu0 %v874_v57 }
 0x378   : > { %v1019_v53 = vpop.permute.xlu0 %1018 }
 0x379   : > { %v1043_v19 = vsel %vm343_vm1, %v1019_v53, 0.0 }
 0x37a   : > { %608 = vadd.xlane.f32.xlu0 %v607_v42 }
 0x37e   : > { %1041 = vadd.xlane.f32.xlu0 %v1040_v7 }
 0x388   : > { %599 = vadd.xlane.f32.xlu1 %v598_v39 }
 0x38c   : > { %605 = vadd.xlane.f32.xlu1 %v604_v33 }
 0x390   : > { %611 = vadd.xlane.f32.xlu1 %v610_v47 }
 0x394   : > { %860 = vadd.xlane.f32.xlu1 %v859_v41  ;;  %v1973_v41 = vld [vmem:[%s2256_s2] ss:$0 sm:$0xff] }
 0x398   : > { %866 = vadd.xlane.f32.xlu1 %v865_v22 }
 0x39c   : > { %872 = vadd.xlane.f32.xlu1 %v871_v44 }
 0x3a0   : > { %878 = vadd.xlane.f32.xlu1 %v877_v20 }
 0x3a4   : > { %1044 = vadd.xlane.f32.xlu1 %v1043_v19 }
 0x3ae   : > { %v594_v56 = vpop.xlane.xlu0 %593 }
 0x3b2   : > { %v1023_v54 = vpop.permute.xlu0 %1022 }
 0x3b3   : > { %v1049_v57 = vsel %vm343_vm1, %v1023_v54, 0.0 }
 0x3b4   : > { %1050 = vadd.xlane.f32.xlu1 %v1049_v57 }
 0x3b6   : > { %v1027_v2 = vpop.permute.xlu0 %1026 }
 0x3b7   : > { %v1055_v42 = vsel %vm343_vm1, %v1027_v2, 0.0 }
 0x3b8   : > { %1056 = vadd.xlane.f32.xlu1 %v1055_v42  ;;  %v417_v42 = vmul.f32 0.0625, %v1800_v55  ;;  %v424_v55 = vmul.f32 0.0625, %v1849_v29 }
 0x3ba   : > { %v1031_v4 = vpop.permute.xlu0 %1030 }
 0x3bb   : > { %v1061_v7 = vsel %vm343_vm1, %v1031_v4, 0.0  ;;  %v419_v4 = vmul.f32 0.0625, %v1805_v25 }
 0x3bc   : > { %1062 = vadd.xlane.f32.xlu1 %v1061_v7  ;;  %v421_v7 = vmul.f32 0.0625, %v1818_v27  ;;  %v614_v27 = vmul.f32 0.0625, %v594_v56 }
 0x3be   : > { %v429_v14 = vadd.f32 1e-05, %v421_v7  ;;  %v622_v7 = vadd.f32 1e-05, %v614_v27 }
 0x3cd   : > { %656 = vrot.lane.b32.xlu1 %v1964_v9, %s1483_s27 }
 0x3d4   : > { %v591_v39 = vpop.xlane.xlu1 %590 }
 0x3d5   : > { %v613_v58 = vmul.f32 0.0625, %v591_v39 }
 0x3d8   : > { %v1021_v37 = vpop.permute.xlu1 %1020 }
 0x3d9   : > { %v1046_v33 = vsel %vm343_vm1, %v1021_v37, 0.0 }
 0x3da   : > { %1047 = vadd.xlane.f32.xlu0 %v1046_v33  ;;  %v423_v33 = vmul.f32 0.0625, %v1821_v61  ;;  %v428_v61 = vadd.f32 1e-05, %v420_v59 }
 0x3dc   : > { %v1025_v31 = vpop.permute.xlu1 %1024  ;;  %v431_v30 = vadd.f32 1e-05, %v423_v33  ;;  %v621_v33 = vadd.f32 1e-05, %v613_v58 }
 0x3dd   : > { %v1052_v47 = vsel %vm343_vm1, %v1025_v31, 0.0 }
 0x3de   : > { %1053 = vadd.xlane.f32.xlu0 %v1052_v47  ;;  %v425_v47 = vadd.f32 1e-05, %v417_v42  ;;  %v430_v42 = vadd.f32 1e-05, %v422_v36 }
 0x3e0   : > { %v1029_v23 = vpop.permute.xlu1 %1028  ;;  %1355 = vrsqrt.f32 %v425_v47 }
 0x3e1   : > { %v1058_v32 = vsel %vm343_vm1, %v1029_v23, 0.0  ;;  %v418_v23 = vmul.f32 0.0625, %v1843_v40 }
 0x3e2   : > { %1059 = vadd.xlane.f32.xlu0 %v1058_v32  ;;  %v427_v32 = vadd.f32 1e-05, %v419_v4  ;;  %v432_v4 = vadd.f32 1e-05, %v424_v55 }
 0x3e3   : > { %v426_v25 = vadd.f32 1e-05, %v418_v23 }
 0x3e4   : > { %1357 = vrsqrt.f32 %v427_v32 }
 0x3e5   : > { %1359 = vrsqrt.f32 %v429_v14 }
 0x3e6   : > { %1361 = vrsqrt.f32 %v431_v30 }
 0x3e7   : > { %1363 = vrsqrt.f32 %v426_v25 }
 0x3e8   : > { %1365 = vrsqrt.f32 %v428_v61 }
 0x3e9   : > { %1367 = vrsqrt.f32 %v430_v42 }
 0x3ea   : > { %1369 = vrsqrt.f32 %v432_v4 }
 0x3eb   : > { %v597_v22 = vpop.xlane.xlu0 %596  ;;  %1371 = vrsqrt.f32 %v622_v7 }
 0x3ec   : > { %v615_v40 = vmul.f32 0.0625, %v597_v22  ;;  %1373 = vrsqrt.f32 %v621_v33 }
 0x3ed   : > { %v1356_v27 = vpop.eup %1355 }
 0x3ee   : > { %v623_v56 = vadd.f32 1e-05, %v615_v40 }
 0x3ef   : > { %v603_v44 = vpop.xlane.xlu0 %602 }
 0x3f0   : > { %v617_v26 = vmul.f32 0.0625, %v603_v44  ;;  %1375 = vrsqrt.f32 %v623_v56 }
 0x3f2   : > { %v625_v59 = vadd.f32 1e-05, %v617_v26 }
 0x3f3   : > { %v858_v20 = vpop.xlane.xlu0 %857 }
 0x3f4   : > { %v880_v28 = vmul.f32 0.0625, %v858_v20  ;;  %1377 = vrsqrt.f32 %v625_v59 }
 0x3f6   : > { %v888_v36 = vadd.f32 1e-05, %v880_v28 }
 0x3f7   : > { %v864_v19 = vpop.xlane.xlu0 %863 }
 0x3f8   : > { %645 = vrot.lane.b32.xlu0 %v1973_v41, %s1483_s27  ;;  %v882_v29 = vmul.f32 0.0625, %v864_v19  ;;  %1379 = vrsqrt.f32 %v888_v36 }
 0x3fa   : > { %v890_v30 = vadd.f32 1e-05, %v882_v29 }
 0x3fb   : > { %v870_v57 = vpop.xlane.xlu0 %869 }
 0x3fc   : > { %v884_v23 = vmul.f32 0.0625, %v870_v57  ;;  %1381 = vrsqrt.f32 %v890_v30 }
 0x3fe   : > { %v892_v44 = vadd.f32 1e-05, %v884_v23 }
 0x3ff   : > { %v876_v37 = vpop.xlane.xlu0 %875 }
 0x400   : > { %v886_v39 = vmul.f32 0.0625, %v876_v37  ;;  %1383 = vrsqrt.f32 %v892_v44 }
 0x402   : > { %v894_v58 = vadd.f32 1e-05, %v886_v39 }
 0x403   : > { %v609_v0 = vpop.xlane.xlu0 %608 }
 0x404   : > { %v619_v14 = vmul.f32 0.0625, %v609_v0  ;;  %v1358_v0 = vpop.eup %1357  ;;  %1385 = vrsqrt.f32 %v894_v58 }
 0x405   : > { %v1360_v4 = vpop.eup %1359 }
 0x406   : > { %v627_v25 = vadd.f32 1e-05, %v619_v14  ;;  %v1362_v26 = vpop.eup %1361 }
 0x407   : > { %v1042_v32 = vpop.xlane.xlu0 %1041  ;;  %v1364_v28 = vpop.eup %1363 }
 0x408   : > { %v1064_v22 = vmul.f32 0.0625, %v1042_v32  ;;  %1387 = vrsqrt.f32 %v627_v25  ;;  %v1366_v56 = vpop.eup %1365 }
 0x40a   : > { %v1072_v37 = vadd.f32 1e-05, %v1064_v22 }
 0x40c   : > { %1389 = vrsqrt.f32 %v1072_v37  ;;  %v445_v37 = vmul.f32 %v1360_v4, %v1698_v10 }
 0x411   : > { %v1976_v21 = vpop.xlane.xlu1 %599 }
 0x412   : > { %v616_v57 = vmul.f32 0.0625, %v1976_v21 }
 0x414   : > { %v624_v7 = vadd.f32 1e-05, %v616_v57  ;;  %v443_v57 = vmul.f32 %v1358_v0, %v1692_v5 }
 0x415   : > { %v1978_v50 = vpop.xlane.xlu1 %605 }
 0x416   : > { %v618_v61 = vmul.f32 0.0625, %v1978_v50  ;;  %v457_v10 = vmul.f32 %v1973_v41, %v443_v57 }
 0x418   : > { %v626_v33 = vadd.f32 1e-05, %v618_v61  ;;  %v447_v61 = vmul.f32 %v1362_v26, %v1706_v15  ;;  %v459_v15 = vmul.f32 %v1973_v41, %v445_v37 }
 0x419   : > { %v1980_v48 = vpop.xlane.xlu1 %611 }
 0x41a   : > { %v620_v21 = vmul.f32 0.0625, %v1980_v48  ;;  %v461_v4 = vmul.f32 %v1973_v41, %v447_v61 }
 0x41d   : > { %v861_v53 = vpop.xlane.xlu1 %860 }
 0x41e   : > { %v881_v20 = vmul.f32 0.0625, %v861_v53 }
 0x420   : > { %v889_v42 = vadd.f32 1e-05, %v881_v20 }
 0x421   : > { %v867_v54 = vpop.xlane.xlu1 %866 }
 0x422   : > { %v883_v19 = vmul.f32 0.0625, %v867_v54  ;;  %1391 = vrsqrt.f32 %v889_v42 }
 0x424   : > { %v891_v53 = vadd.f32 1e-05, %v883_v19 }
 0x425   : > { %v1982_v2 = vpop.xlane.xlu1 %872 }
 0x426   : > { %v885_v40 = vmul.f32 0.0625, %v1982_v2  ;;  %v1368_v2 = vpop.eup %1367  ;;  %1393 = vrsqrt.f32 %v891_v53  ;;  %v444_v53 = vmul.f32 %v1366_v56, %v1742_v52 }
 0x427   : > { %v1370_v36 = vpop.eup %1369  ;;  %1395 = vrsqrt.f32 %v624_v7  ;;  %v446_v7 = vmul.f32 %v1368_v2, %v1749_v38  ;;  %v2027_v2 = vadd.f32 %v1964_v9, %v457_v10 }
 0x428   : > { %v893_v23 = vadd.f32 1e-05, %v885_v40  ;;  %v1999_v30 = vpop.eup %1371  ;;  %1397 = vrsqrt.f32 %v626_v33  ;;  %v442_v40 = vmul.f32 %v1364_v28, %v1738_v49  ;;  %v448_v5 = vmul.f32 %v1370_v36, %v1755_v63 }
 0x429   : > { %v1988_v31 = vpop.xlane.xlu1 %878  ;;  %v2001_v22 = vpop.eup %1373  ;;  %v458_v26 = vmul.f32 %v1973_v41, %v444_v53  ;;  %v460_v38 = vmul.f32 %v1973_v41, %v446_v7  ;;  %v638_v37 = vmul.f32 %v1999_v30, %v1777_v35 }
 0x42a   : > { %v887_v54 = vmul.f32 0.0625, %v1988_v31  ;;  %v628_v31 = vadd.f32 1e-05, %v620_v21  ;;  %1399 = vrsqrt.f32 %v893_v23  ;;  %v2003_v44 = vpop.eup %1375  ;;  %v456_v52 = vmul.f32 %v1973_v41, %v442_v40 }
 0x42b   : > { %v1378_v20 = vpop.eup %1377  ;;  %v462_v56 = vmul.f32 %v1973_v41, %v448_v5  ;;  %v637_v40 = vmul.f32 %v2001_v22, %v1825_v6  ;;  %v639_v53 = vmul.f32 %v2003_v44, %v1780_v45 }
 0x42c   : > { %v895_v59 = vadd.f32 1e-05, %v887_v54  ;;  %v1380_v19 = vpop.eup %1379  ;;  %v2037_v36 = vadd.f32 %v1964_v9, %v456_v52  ;;  %v641_v7 = vmul.f32 %v1378_v20, %v1792_v16 }
 0x42d   : > { %v1045_v46 = vpop.xlane.xlu1 %1044  ;;  %v1382_v25 = vpop.eup %1381  ;;  %v904_v28 = vmul.f32 %v1380_v19, %v1894_v3  ;;  %v2050_v57 = vadd.f32 %v1964_v9, %v462_v56 }
 0x42e   : > { %v1065_v29 = vmul.f32 0.0625, %v1045_v46  ;;  %1401 = vrsqrt.f32 %v895_v59  ;;  %v1384_v42 = vpop.eup %1383  ;;  %v906_v33 = vmul.f32 %v1382_v25, %v1903_v17  ;;  %v2030_v59 = vadd.f32 %v1964_v9, %v459_v15 }
 0x42f   : > { %1403 = vrsqrt.f32 %v628_v31  ;;  %v1386_v54 = vpop.eup %1385  ;;  %v2040_v31 = vadd.f32 %v1964_v9, %v458_v26 }
 0x430   : > { %v1073_v48 = vadd.f32 1e-05, %v1065_v29  ;;  %v914_v19 = vmul.f32 %v1973_v41, %v906_v33  ;;  %v2073_v16 = vmul.f32 %v1386_v54, %v1915_v11 }
 0x432   : > { %1405 = vrsqrt.f32 %v1073_v48  ;;  %v2067_v6 = vadd.f32 %v1964_v9, %v914_v19 }
 0x43d   : > { %v1051_v47 = vpop.xlane.xlu1 %1050 }
 0x43e   : > { %v1067_v32 = vmul.f32 0.0625, %v1051_v47 }
 0x440   : > { %v1075_v46 = vadd.f32 1e-05, %v1067_v32 }
 0x441   : > { %v1057_v55 = vpop.xlane.xlu1 %1056 }
 0x442   : > { %v1069_v39 = vmul.f32 0.0625, %v1057_v55  ;;  %v441_v55 = vmul.f32 %v1356_v27, %v1689_v1  ;;  %1407 = vrsqrt.f32 %v1075_v46  ;;  %v1388_v1 = vpop.eup %1387 }
 0x443   : > { %v1390_v0 = vpop.eup %1389 }
 0x444   : > { %v1077_v47 = vadd.f32 1e-05, %v1069_v39  ;;  %v455_v27 = vmul.f32 %v1973_v41, %v441_v55  ;;  %v1392_v49 = vpop.eup %1391  ;;  %v2033_v39 = vadd.f32 %v1964_v9, %v461_v4 }
 0x445   : > { %v1063_v50 = vpop.xlane.xlu1 %1062  ;;  %v1394_v21 = vpop.eup %1393  ;;  %v905_v3 = vmul.f32 %v1392_v49, %v1929_v13  ;;  %v908_v13 = vmul.f32 %v1384_v42, %v1909_v8 }
 0x446   : > { %v1071_v14 = vmul.f32 0.0625, %v1063_v50  ;;  %1409 = vrsqrt.f32 %v1077_v47  ;;  %v1396_v29 = vpop.eup %1395  ;;  %v2023_v50 = vadd.f32 %v1964_v9, %v455_v27  ;;  %v2044_v47 = vadd.f32 %v1964_v9, %v460_v38 }
 0x447   : > { %v1398_v32 = vpop.eup %1397  ;;  %v913_v8 = vmul.f32 %v1973_v41, %v905_v3  ;;  %v2070_v45 = vmul.f32 %v1973_v41, %v908_v13  ;;  %v640_v4 = vmul.f32 %v1396_v29, %v1829_v12  ;;  %v2276_v12 = vld [vmem:[#allocation6_spill] sm:$0xff] }
 0x448   : > { %v1079_v58 = vadd.f32 1e-05, %v1071_v14  ;;  %v1400_v17 = vpop.eup %1399  ;;  %v907_v14 = vmul.f32 %v1394_v21, %v1934_v18  ;;  %v642_v49 = vmul.f32 %v1398_v32, %v1786_v51  ;;  %v2277_v51 = vld [vmem:[#allocation7_spill] sm:$0xff] }
 0x449   : > { %v1402_v46 = vpop.eup %1401  ;;  %v909_v5 = vmul.f32 %v1400_v17, %v1941_v43  ;;  %v643_v43 = vmul.f32 %v1388_v1, %v1810_v62  ;;  %v2081_v26 = vadd.f32 %v1964_v9, %v913_v8  ;;  %v2275_v1 = vld [vmem:[#allocation5_spill] sm:$0xff] }
 0x44a   : > { %1411 = vrsqrt.f32 %v1079_v58  ;;  %v912_v58 = vmul.f32 %v1973_v41, %v904_v28  ;;  %v1404_v25 = vpop.eup %1403  ;;  %v915_v27 = vmul.f32 %v1973_v41, %v907_v14  ;;  %v911_v35 = vmul.f32 %v1402_v46, %v1948_v34 }
 0x44b   : > { %v1406_v61 = vpop.eup %1405  ;;  %v1088_v34 = vmul.f32 %v1390_v0, %v1835_v24  ;;  %v644_v52 = vmul.f32 %v1404_v25, %v1803_v60  ;;  %v917_v62 = vmul.f32 %v1973_v41, %v909_v5  ;;  %v2278_v60 = vld [vmem:[#allocation8_spill] sm:$0xff] }
 0x44c   : > { %v2064_v15 = vadd.f32 %v1964_v9, %v912_v58  ;;  %v2085_v11 = vadd.f32 %v1964_v9, %v915_v27  ;;  %v919_v24 = vmul.f32 %v1973_v41, %v911_v35  ;;  %v1089_v0 = vmul.f32 %v1406_v61, %v2275_v1  ;;  %v2279_v35 = vld [vmem:[#allocation9_spill] sm:$0xff] }
 0x44f   : > { %v1408_v42 = vpop.eup %1407 }
 0x450   : > { %v1091_v21 = vmul.f32 %v1408_v42, %v2276_v12 }
 0x453   : > { %v1410_v10 = vpop.eup %1409 }
 0x454   : > { %v1093_v38 = vmul.f32 %v1410_v10, %v2277_v51  ;;  %v918_v51 = vmul.f32 %v1973_v41, %v2073_v16 }
 0x457   : > { %v1412_v44 = vpop.eup %1411 }
 0x458   : > { %v1095_v28 = vmul.f32 %v1412_v44, %v2278_v60 }
 0x463   : > { %v1048_v63 = vpop.xlane.xlu0 %1047 }
 0x464   : > { %v1066_v23 = vmul.f32 0.0625, %v1048_v63 }
 0x466   : > { %v1074_v48 = vadd.f32 1e-05, %v1066_v23  ;;  %v2098_v23 = vpop.permute.xlu1 %656 }
 0x467   : > { %v1054_v55 = vpop.xlane.xlu0 %1053 }
 0x468   : > { %1413 = vrsqrt.f32 %v1074_v48  ;;  %v1068_v18 = vmul.f32 0.0625, %v1054_v55 }
 0x46a   : > { %v1076_v30 = vadd.f32 1e-05, %v1068_v18 }
 0x46b   : > { %v1060_v22 = vpop.xlane.xlu0 %1059 }
 0x46c   : > { %1415 = vrsqrt.f32 %v1076_v30  ;;  %v1070_v20 = vmul.f32 0.0625, %v1060_v22 }
 0x46e   : > { %v1078_v54 = vadd.f32 1e-05, %v1070_v20  ;;  %v927_v20 = vadd.f32 %v1964_v9, %v919_v24 }
 0x46f   : > { %v2093_v33 = vpop.permute.xlu0 %645 }
 0x470   : > { %1417 = vrsqrt.f32 %v1078_v54  ;;  %v648_v63 = vmul.f32 %v2093_v33, %v637_v40  ;;  %v649_v29 = vmul.f32 %v2093_v33, %v638_v37  ;;  %v650_v56 = vmul.f32 %v2093_v33, %v639_v53 }
 0x471   : > { %v651_v32 = vmul.f32 %v2093_v33, %v640_v4  ;;  %v652_v3 = vmul.f32 %v2093_v33, %v641_v7  ;;  %v653_v17 = vmul.f32 %v2093_v33, %v642_v49  ;;  %v654_v14 = vmul.f32 %v2093_v33, %v643_v43 }
 0x472   : > { %v655_v48 = vmul.f32 %v2093_v33, %v644_v52  ;;  %v1096_v46 = vmul.f32 %v1088_v34, %v2093_v33  ;;  %v1097_v58 = vmul.f32 %v1089_v0, %v2093_v33  ;;  %v1099_v19 = vmul.f32 %v1091_v21, %v2093_v33  ;;  %v2280_v52 = vld [vmem:[#allocation10_spill] sm:$0xff] }
 0x473   : > { %v1101_v13 = vmul.f32 %v1093_v38, %v2093_v33  ;;  %v1103_v55 = vmul.f32 %v1095_v28, %v2093_v33  ;;  %v659_v25 = vadd.f32 %v2098_v23, %v648_v63  ;;  %v660_v37 = vadd.f32 %v2098_v23, %v649_v29  ;;  %v2281_v38 = vld [vmem:[#allocation11_spill] sm:$0xff] }
 0x474   : > { %v661_v18 = vadd.f32 %v2098_v23, %v650_v56  ;;  %v662_v61 = vadd.f32 %v2098_v23, %v651_v32  ;;  %v663_v40 = vadd.f32 %v2098_v23, %v652_v3  ;;  %v664_v53 = vadd.f32 %v2098_v23, %v653_v17 }
 0x475   : > { %v1414_v7 = vpop.eup %1413  ;;  %v665_v8 = vadd.f32 %v2098_v23, %v654_v14  ;;  %v666_v42 = vadd.f32 %v2098_v23, %v655_v48  ;;  %v667_v27 = vsel %vm343_vm1, %v2023_v50, %v659_v25  ;;  %v668_v5 = vsel %vm343_vm1, %v2037_v36, %v660_v37 }
 0x476   : > { %v1090_v30 = vmul.f32 %v1414_v7, %v2279_v35  ;;  %v669_v10 = vsel %vm343_vm1, %v2027_v2, %v661_v18  ;;  %v670_v22 = vsel %vm343_vm1, %v2040_v31, %v662_v61  ;;  %v671_v44 = vsel %vm343_vm1, %v2030_v59, %v663_v40  ;;  %675 = vst.msk [vmem:[%s2131_s6] sm:$0xff] %vm213_vm0, %v667_v27 }
 0x477   : > { %676 = vst.msk [vmem:[%s2131_s6 + $0x10] sm:$0xff] %vm213_vm0, %v668_v5  ;;  %v672_v50 = vsel %vm343_vm1, %v2044_v47, %v664_v53  ;;  %v673_v2 = vsel %vm343_vm1, %v2033_v39, %v665_v8  ;;  %v674_v59 = vsel %vm343_vm1, %v2050_v57, %v666_v42  ;;  %677 = vst.msk [vmem:[%s2131_s6 + $0x20] sm:$0xff] %vm213_vm0, %v669_v10 }
 0x478   : > { %678 = vst.msk [vmem:[%s2131_s6 + $0x30] sm:$0xff] %vm213_vm0, %v670_v22  ;;  %679 = vst.msk [vmem:[%s2131_s6 + $0x40] sm:$0xff] %vm213_vm0, %v671_v44  ;;  %v1104_v36 = vadd.f32 %v1096_v46, %v2098_v23  ;;  %v1098_v31 = vmul.f32 %v1090_v30, %v2093_v33  ;;  %v1105_v39 = vadd.f32 %v1097_v58, %v2098_v23 }
 0x479   : > { %680 = vst.msk [vmem:[%s2131_s6 + $0x50] sm:$0xff] %vm213_vm0, %v672_v50  ;;  %681 = vst.msk [vmem:[%s2131_s6 + $0x60] sm:$0xff] %vm213_vm0, %v673_v2  ;;  %v1107_v47 = vadd.f32 %v1099_v19, %v2098_v23  ;;  %v1109_v57 = vadd.f32 %v1101_v13, %v2098_v23  ;;  %v1416_v43 = vpop.eup %1415  ;;  %v925_v34 = vadd.f32 %v1964_v9, %v917_v62 }
 0x47a   : > { %682 = vst.msk [vmem:[%s2131_s6 + $0x70] sm:$0xff] %vm213_vm0, %v674_v59  ;;  %v1111_v4 = vadd.f32 %v1103_v55, %v2098_v23  ;;  %v1112_v49 = vsel %vm343_vm1, %v2064_v15, %v1104_v36  ;;  %v1092_v54 = vmul.f32 %v1416_v43, %v2280_v52  ;;  %v1106_v1 = vadd.f32 %v1098_v31, %v2098_v23 }
 0x47b   : > { %v1113_v0 = vsel %vm343_vm1, %v2081_v26, %v1105_v39  ;;  %v1115_v12 = vsel %vm343_vm1, %v2085_v11, %v1107_v47  ;;  %1231 = vst.msk [vmem:[%s2131_s6 + $0x8] sm:$0xff] %vm213_vm0, %v1112_v49  ;;  %v1117_v62 = vsel %vm343_vm1, %v925_v34, %v1109_v57  ;;  %v924_v21 = vadd.f32 %v1964_v9, %v2070_v45 }
 0x47c   : > { %v1119_v24 = vsel %vm343_vm1, %v927_v20, %v1111_v4  ;;  %1232 = vst.msk [vmem:[%s2131_s6 + $0x18] sm:$0xff] %vm213_vm0, %v1113_v0  ;;  %1234 = vst.msk [vmem:[%s2131_s6 + $0x38] sm:$0xff] %vm213_vm0, %v1115_v12  ;;  %v1100_v15 = vmul.f32 %v1092_v54, %v2093_v33  ;;  %v1114_v26 = vsel %vm343_vm1, %v2067_v6, %v1106_v1 }
 0x47d   : > { %1236 = vst.msk [vmem:[%s2131_s6 + $0x58] sm:$0xff] %vm213_vm0, %v1117_v62  ;;  %1238 = vst.msk [vmem:[%s2131_s6 + $0x78] sm:$0xff] %vm213_vm0, %v1119_v24  ;;  %v1418_v11 = vpop.eup %1417  ;;  %v926_v29 = vadd.f32 %v1964_v9, %v918_v51 }
 0x47e   : > { %1233 = vst.msk [vmem:[%s2131_s6 + $0x28] sm:$0xff] %vm213_vm0, %v1114_v26  ;;  %v1094_v60 = vmul.f32 %v1418_v11, %v2281_v38  ;;  %v1108_v6 = vadd.f32 %v1100_v15, %v2098_v23 }
 0x480   : > { %v1102_v28 = vmul.f32 %v1094_v60, %v2093_v33  ;;  %v1116_v63 = vsel %vm343_vm1, %v924_v21, %v1108_v6 }
 0x481   : > { %1235 = vst.msk [vmem:[%s2131_s6 + $0x48] sm:$0xff] %vm213_vm0, %v1116_v63 }
 0x482   : > { %v1110_v45 = vadd.f32 %v1102_v28, %v2098_v23 }
 0x484   : > { %v1118_v41 = vsel %vm343_vm1, %v926_v29, %v1110_v45 }
 0x485   : > { %1237 = vst.msk [vmem:[%s2131_s6 + $0x68] sm:$0xff] %vm213_vm0, %v1118_v41 }
 0x486   : > { %1432 = shalt.err (!%p1429_p3)
}
 0x487   : > { %s1433_s22 = scalar_lea.hbm %s2205_s11, 2048  ;;  %s1437_s28 = scalar_lea.hbm %s2258_s4, 4096 }
 0x488   : > { %p1434_p4 = scmp.ne.s32.totalorder %s2205_s11, %s1433_s22  ;;  %p1438_p9 = scmp.lt.s32.totalorder %s2205_s11, %s2258_s4 }
 0x489   : > { %p1439_p10 = scmp.lt.s32.totalorder %s1437_s28, %s1433_s22 }
 0x48a   : > { %p1435_p7 = pnand %p1434_p4, %p1550_p5 }
 0x48b   : > { %p1440_p11 = por %p1439_p10, %p1438_p9 }
 0x48c   : > { %p1436_p8 = pneg %p1435_p7 }
 0x48e   : > { %p1441_p12 = pnand %p1440_p11, %p1436_p8 }
 0x490   : > { %1444 = shalt.err (!%p1441_p12)
}
 0x491   : > { %s1485_s5 = smov 128   ;;  %s1486_s6 = smov 8  }
 0x492   : > { %1311 = dma.vmem_to_hbm [thread:$0]  (%p1550_p5), %s2207_s8, 2048, %s2205_s11, %s2214_s19, %s1485_s5, %s1485_s5, %s1486_s6  }
 0x493 PF: > { %p1317_p13 = scmp.ge.s32.totalorder %s1479_s18, 2  ;;  %s1159_s7 = sand.u32 1, %s1467_s15  }
 0x494   : > { %s1160_s9 = scalar_lea.sflag [#allocation3], %s1159_s7 }
 0x495   : > { %p1314_p0 = pnand %p1317_p13, %p1554_p6 }
 0x497   : > { %p1315_p1 = pneg %p1314_p0 }
 0x499   : > { %1462 = dma.done.wait (%p1315_p1), %s1160_s9, 2048  }
 0x49a   : > { %1464 = vsyncadd (%p1315_p1), %s1160_s9, 4294965248  ;;  %p14_p2 = scmp.ge.s32.totalorder %s1537_s21, 4   ;;  %s2282_s15 = smov %s1471_s16 }
 0x49b   : > { %s2283_s16 = smov %s1475_s17  ;;  %s2284_s17 = smov %s1548_s24 }
 0x49c   : > { %s2285_s18 = smov %s1537_s21  ;;  %16 = sbr.rel (!%p14_p2) target bundleno = 3 (0x3), region = 72 }
 0x4a1   :  { %1165 = vsyncpa [#allocation3], 1 }
 0x4a2   :  { %1167 = vsyncpa [#allocation3 + $0x1], 1 }

</bundles_post_ra>
